<compile_context>
chip_gen: v7x
topology: tpu7x:2x2x1
jax: 0.10.0
libtpu: 0.0.40
codegen_flags: <defaults>
</compile_context>

<pallas_src>
import functools

import numpy as np
import jax
import jax.numpy as jnp
from jax import lax
from jax.experimental import pallas as pl
from jax.experimental.pallas import tpu as pltpu


def _round_up(x, m):
    return (x + m - 1) // m * m


# -----------------------------------------------------------------------------
# Kernel 1: packed complex QKV projections (on pre-pooled K/V), fused QK^T,
#           masked softmax, fused attention@V, combined weights/scores,
#           written to a single lane-dense output slab.
# -----------------------------------------------------------------------------
def _attn_kernel(scale, b_tile, q_len, l_pad, l_out, d_k, d_v, slab_w,
                 q2_ref, k2_ref, v2_ref,
                 wq_ref, wk_ref, wv_ref,
                 bq_ref, bk_ref, bv_ref,
                 slab_ref):
    f32 = jnp.float32

    # --- one packed matmul per projection, over the whole batch tile ---------
    qp = jnp.dot(q2_ref[...], wq_ref[...], preferred_element_type=f32) + bq_ref[...]
    kp = jnp.dot(k2_ref[...], wk_ref[...], preferred_element_type=f32) + bk_ref[...]
    vp = jnp.dot(v2_ref[...], wv_ref[...], preferred_element_type=f32) + bv_ref[...]

    q_r_all, q_i_all = qp[:, :d_k], qp[:, d_k:]
    k_r1, k_i1 = kp[:, :d_k], kp[:, d_k:]
    v_r1, v_i1 = vp[:, :d_v], vp[:, d_v:]

    # post-pool complex recombination (exact torch semantics)
    k_r_all = k_r1 - k_i1
    k_i_all = k_i1 + k_r1
    v_r_all = v_r1 - v_i1
    v_i_all = v_i1 + v_r1

    # validity mask for the zero-padded pooled positions (cols >= l_out)
    col_valid = lax.broadcasted_iota(jnp.int32, (2 * q_len, l_pad), 1) < l_out

    def masked_softmax(s):
        s = jnp.where(col_valid, s, -1e30)
        m = jnp.max(s, axis=-1, keepdims=True)
        e = jnp.where(col_valid, jnp.exp(s - m), 0.0)
        inv = pl.reciprocal(jnp.sum(e, axis=-1, keepdims=True), approx=False)
        return e * inv

    pad_w = slab_w - (2 * d_v + 4 * l_pad)
    zpad = jnp.zeros((q_len, pad_w), f32) if pad_w else None

    for b in range(b_tile):
        qs = slice(b * q_len, (b + 1) * q_len)
        ls = slice(b * l_pad, (b + 1) * l_pad)
        q_r, q_i = q_r_all[qs], q_i_all[qs]
        k_r, k_i = k_r_all[ls], k_i_all[ls]
        v_r, v_i = v_r_all[ls], v_i_all[ls]

        # --- fused QK^T: all four real/imag score blocks in one MXU call -----
        q_stack = jnp.concatenate([q_r, q_i], axis=0)          # [2q, d_k]
        k_stack = jnp.concatenate([k_r, k_i], axis=0)          # [2L, d_k]
        s = lax.dot_general(q_stack, k_stack,
                            (((1,), (1,)), ((), ())),
                            preferred_element_type=f32) * scale  # [2q, 2L]

        s_left, s_right = s[:, :l_pad], s[:, l_pad:]
        w_left = masked_softmax(s_left)      # rows [:q] = rr, [q:] = ir
        w_right = masked_softmax(s_right)    # rows [:q] = ri, [q:] = ii

        s_rr, s_ir = s_left[:q_len], s_left[q_len:]
        s_ri, s_ii = s_right[:q_len], s_right[q_len:]
        w_rr, w_ir = w_left[:q_len], w_left[q_len:]
        w_ri, w_ii = w_right[:q_len], w_right[q_len:]

        as_r = s_rr - s_ri - s_ir - s_ii
        as_i = s_rr + s_ri + s_ir - s_ii
        aw_r = w_rr - w_ri - w_ir - w_ii
        aw_i = w_rr + w_ri + w_ir - w_ii

        # --- fused attention @ V: one MXU call gives all four products -------
        wa = w_rr - w_ii
        wb = w_ri + w_ir
        w_stack = jnp.concatenate([wa, wb], axis=0)            # [2q, L]
        v_cat = jnp.concatenate([v_r, v_i], axis=-1)           # [L, 2*d_v]
        r = jnp.dot(w_stack, v_cat, preferred_element_type=f32)  # [2q, 2*d_v]
        out_r = r[:q_len, :d_v] - r[q_len:, d_v:]              # wa@vr - wb@vi
        out_i = r[:q_len, d_v:] + r[q_len:, :d_v]              # wa@vi + wb@vr

        # --- lane-dense slab row-block store ----------------------------------
        pieces = [out_r, out_i, aw_r, aw_i, as_r, as_i]
        if zpad is not None:
            pieces.append(zpad)
        slab_ref[pl.ds(b * q_len, q_len), :] = jnp.concatenate(pieces, axis=-1)


# -----------------------------------------------------------------------------
# Kernel 2: to_out projection for ALL batches and both real/imag parts in a
#           single matmul, lane-dense padded output.
# -----------------------------------------------------------------------------
def _to_out_kernel(n_rows, d_model, out_w, x_ref, w_ref, b_ref, slab_ref):
    f32 = jnp.float32
    p = jnp.dot(x_ref[...], w_ref[...], preferred_element_type=f32) + b_ref[...]
    pr, pi = p[:n_rows], p[n_rows:]
    re = pr - pi
    im = pr + pi
    pieces = [re, im]
    pad_w = out_w - 2 * d_model
    if pad_w:
        pieces.append(jnp.zeros((n_rows, pad_w), f32))
    slab_ref[...] = jnp.concatenate(pieces, axis=-1)


# -----------------------------------------------------------------------------
# Wrapper
# -----------------------------------------------------------------------------
def multihead_attention_fu(Q, K, V, params, *, kernel_size, stride, n_heads):
    """Q: complex64 [bs, q_len, d_model]; K, V: complex64 [bs, seq_len, d_model]."""
    bs, q_len, d_model = Q.shape
    seq_len = K.shape[1]
    d_k = params["W_Q"].shape[1]
    d_v = params["W_V"].shape[1]
    assert n_heads == 1, "torch module's to_out only type-checks with n_heads == 1"
    assert q_len % 8 == 0, "q_len must be a multiple of 8 (sublane tile)"
    head_dim = d_model // n_heads
    scale = float(head_dim) ** -0.5

    l_out = (seq_len - kernel_size) // stride + 1
    l_pad = _round_up(l_out, 8)

    f32 = jnp.float32
    Qr, Qi = jnp.real(Q).astype(f32), jnp.imag(Q).astype(f32)
    Kr, Ki = jnp.real(K).astype(f32), jnp.imag(K).astype(f32)
    Vr, Vi = jnp.real(V).astype(f32), jnp.imag(V).astype(f32)

    # AvgPool1d as a matmul, applied BEFORE the projections:
    # P @ (X @ W) + b == (P @ X) @ W + b because every valid pool row sums to 1.
    # Extra (zero) rows pad L_out up to a sublane multiple; they are masked in
    # the kernel's softmax.
    rows = jnp.arange(l_pad)[:, None]
    cols = jnp.arange(seq_len)[None, :]
    starts = rows * stride
    pool = jnp.where((rows < l_out) & (cols >= starts) & (cols < starts + kernel_size),
                     1.0 / kernel_size, 0.0).astype(f32)           # [l_pad, seq]

    # packed complex inputs  [x_real | x_imag]  (batch flattened into rows)
    Q2 = jnp.concatenate([Qr, Qi], axis=-1).reshape(bs * q_len, 2 * d_model)
    K2 = jnp.einsum("ls,bsd->bld", pool,
                    jnp.concatenate([Kr, Ki], axis=-1)).reshape(bs * l_pad, 2 * d_model)
    V2 = jnp.einsum("ls,bsd->bld", pool,
                    jnp.concatenate([Vr, Vi], axis=-1)).reshape(bs * l_pad, 2 * d_model)

    # packed complex weights: [x_r | x_i] @ [[W, Wi], [-Wi, W]] + [b-bi | b+bi]
    def pack_w(w, wi):
        return jnp.concatenate(
            [jnp.concatenate([w, wi], axis=1),
             jnp.concatenate([-wi, w], axis=1)], axis=0).astype(f32)

    def pack_b(b, bi):
        return jnp.concatenate([b - bi, b + bi]).reshape(1, -1).astype(f32)

    W2q = pack_w(params["W_Q"], params["W_Qimag"])
    W2k = pack_w(params["W_K"], params["W_Kimag"])
    W2v = pack_w(params["W_V"], params["W_Vimag"])
    b2q = pack_b(params["b_Q"], params["b_Qimag"])
    b2k = pack_b(params["b_K"], params["b_Kimag"])
    b2v = pack_b(params["b_V"], params["b_Vimag"])

    b_tile = bs                      # whole batch in one grid step (bs is small)
    n_tiles = bs // b_tile
    slab_w = _round_up(2 * d_v + 4 * l_pad, 128)

    kernel1 = functools.partial(_attn_kernel, scale, b_tile, q_len, l_pad,
                                l_out, d_k, d_v, slab_w)

    def row_spec(rows_per_tile, width):
        return pl.BlockSpec((rows_per_tile, width), lambda t: (t, 0))

    def full_spec(shape):
        return pl.BlockSpec(shape, lambda t: (0, 0))

    slab = pl.pallas_call(
        kernel1,
        grid=(n_tiles,),
        in_specs=[
            row_spec(b_tile * q_len, 2 * d_model),
            row_spec(b_tile * l_pad, 2 * d_model),
            row_spec(b_tile * l_pad, 2 * d_model),
            full_spec((2 * d_model, 2 * d_k)),
            full_spec((2 * d_model, 2 * d_k)),
            full_spec((2 * d_model, 2 * d_v)),
            full_spec((1, 2 * d_k)), full_spec((1, 2 * d_k)), full_spec((1, 2 * d_v)),
        ],
        out_specs=row_spec(b_tile * q_len, slab_w),
        out_shape=jax.ShapeDtypeStruct((bs * q_len, slab_w), f32),
        compiler_params=pltpu.CompilerParams(
            dimension_semantics=("parallel",),          # v7x megacore sharding
            vmem_limit_bytes=64 * 1024 * 1024),
    )(Q2, K2, V2, W2q, W2k, W2v, b2q, b2k, b2v)

    slab3 = slab.reshape(bs, q_len, slab_w)
    out_r = slab3[:, :, :d_v]
    out_i = slab3[:, :, d_v:2 * d_v]
    base = 2 * d_v
    aw_r = slab3[:, :, base:base + l_out]
    aw_i = slab3[:, :, base + l_pad:base + l_pad + l_out]
    as_r = slab3[:, :, base + 2 * l_pad:base + 2 * l_pad + l_out]
    as_i = slab3[:, :, base + 3 * l_pad:base + 3 * l_pad + l_out]

    attn_weights = lax.complex(aw_r, aw_i)
    attn_scores = lax.complex(as_r, as_i)

    # torch: output.transpose(1, 2).contiguous().view(bs, -1, n_heads * d_v)
    # (pure data re-interpretation, tiny; kept as XLA glue.)
    # TODO(synk): fold this reinterpretation + to_out into kernel 1 once the
    # lane/sublane-mixing in-kernel reshape is guaranteed on all targets.
    scr_r = jnp.transpose(out_r, (0, 2, 1)).reshape(bs, -1, n_heads * d_v)
    scr_i = jnp.transpose(out_i, (0, 2, 1)).reshape(bs, -1, n_heads * d_v)
    new_q = scr_r.shape[1]
    n_rows = bs * new_q

    x_all = jnp.concatenate([scr_r.reshape(n_rows, n_heads * d_v),
                             scr_i.reshape(n_rows, n_heads * d_v)], axis=0)

    out2_w = _round_up(2 * d_model, 128)
    kernel2 = functools.partial(_to_out_kernel, n_rows, d_model, out2_w)

    slab2 = pl.pallas_call(
        kernel2,
        grid=(1,),
        in_specs=[
            pl.BlockSpec((2 * n_rows, n_heads * d_v), lambda t: (0, 0)),
            pl.BlockSpec((n_heads * d_v, d_model), lambda t: (0, 0)),
            pl.BlockSpec((1, d_model), lambda t: (0, 0)),
        ],
        out_specs=pl.BlockSpec((n_rows, out2_w), lambda t: (0, 0)),
        out_shape=jax.ShapeDtypeStruct((n_rows, out2_w), f32),
        compiler_params=pltpu.CompilerParams(
            dimension_semantics=("arbitrary",),
            vmem_limit_bytes=64 * 1024 * 1024),
    )(x_all, params["W_out"].astype(f32), params["b_out"].reshape(1, -1).astype(f32))

    out_real = slab2[:, :d_model].reshape(bs, new_q, d_model)
    out_imag = slab2[:, d_model:2 * d_model].reshape(bs, new_q, d_model)
    output = lax.complex(out_real, out_imag)
    return output, attn_weights, attn_scores


# -----------------------------------------------------------------------------
# Pure-JAX reference (literal transcription of the torch forward, 8 sdp calls)
# -----------------------------------------------------------------------------
def reference_forward(Q, K, V, params, *, kernel_size, stride, n_heads):
    bs, q_len, d_model = Q.shape
    head_dim = d_model // n_heads
    scale = float(head_dim) ** -0.5
    d_v = params["W_V"].shape[1]

    def lin(x, w, b):
        return x @ w + b

    Qr, Qi = jnp.real(Q), jnp.imag(Q)
    Kr, Ki = jnp.real(K), jnp.imag(K)
    Vr, Vi = jnp.real(V), jnp.imag(V)

    p = params
    Q_real = lin(Qr, p["W_Q"], p["b_Q"]) - lin(Qi, p["W_Qimag"], p["b_Qimag"])
    Q_imag = lin(Qi, p["W_Q"], p["b_Q"]) + lin(Qr, p["W_Qimag"], p["b_Qimag"])
    K_real1 = lin(Kr, p["W_K"], p["b_K"]) - lin(Ki, p["W_Kimag"], p["b_Kimag"])
    K_imag1 = lin(Ki, p["W_K"], p["b_K"]) + lin(Kr, p["W_Kimag"], p["b_Kimag"])
    V_real1 = lin(Vr, p["W_V"], p["b_V"]) - lin(Vi, p["W_Vimag"], p["b_Vimag"])
    V_imag1 = lin(Vi, p["W_V"], p["b_V"]) + lin(Vr, p["W_Vimag"], p["b_Vimag"])

    def avg_pool_ncl(x):  # x: [bs, C, L] -> [bs, C, L_out]
        L_out = (x.shape[-1] - kernel_size) // stride + 1
        return jnp.stack([x[..., l * stride:l * stride + kernel_size].mean(-1)
                          for l in range(L_out)], axis=-1)

    t = lambda x: jnp.transpose(x, (0, 2, 1))
    K_real = avg_pool_ncl(t(K_real1)) - avg_pool_ncl(t(K_imag1))   # [bs, d_k, L]
    K_imag = avg_pool_ncl(t(K_imag1)) + avg_pool_ncl(t(K_real1))
    V_real = t(avg_pool_ncl(t(V_real1))) - t(avg_pool_ncl(t(V_imag1)))  # [bs,L,d_v]
    V_imag = t(avg_pool_ncl(t(V_imag1))) + t(avg_pool_ncl(t(V_real1)))

    def sdp(q, k, v):
        s = jnp.matmul(q, k) * scale
        w = jax.nn.softmax(s, axis=-1)
        return jnp.matmul(w, v), w, s

    o1, w1, s1 = sdp(Q_real, K_real, V_real)
    o2, w2, s2 = sdp(Q_real, K_imag, V_imag)
    o3, w3, s3 = sdp(Q_imag, K_real, V_imag)
    o4, w4, s4 = sdp(Q_imag, K_imag, V_real)
    o5, w5, s5 = sdp(Q_real, K_real, V_imag)
    o6, w6, s6 = sdp(Q_real, K_imag, V_real)
    o7, w7, s7 = sdp(Q_imag, K_real, V_real)
    o8, w8, s8 = sdp(Q_imag, K_imag, V_imag)

    out = lax.complex(o1 - o2 - o3 - o4, o5 + o6 + o7 - o8)
    attn_w = lax.complex(w1 - w2 - w3 - w4, w5 + w6 + w7 - w8)
    attn_s = lax.complex(s1 - s2 - s3 - s4, s5 + s6 + s7 - s8)

    out = jnp.transpose(out, (0, 2, 1)).reshape(bs, -1, n_heads * d_v)
    outr = jnp.real(out) @ p["W_out"] + p["b_out"]
    outi = jnp.imag(out) @ p["W_out"] + p["b_out"]
    output = lax.complex(outr - outi, outr + outi)
    return output, attn_w, attn_s


if __name__ == "__main__":
    bs, q_len, seq_len, d_model = 2, 8, 16, 32
    n_heads = 1                       # required by the torch module's to_out shape
    kernel_size, stride = 4, 2
    d_k = d_v = d_model

    key = jax.random.PRNGKey(0)
    keys = jax.random.split(key, 20)

    def w(k, shape):
        return jax.random.normal(k, shape, jnp.float32) * 0.1

    params = {
        "W_Q": w(keys[0], (d_model, d_k)),     "b_Q": w(keys[1], (d_k,)),
        "W_Qimag": w(keys[2], (d_model, d_k)), "b_Qimag": w(keys[3], (d_k,)),
        "W_K": w(keys[4], (d_model, d_k)),     "b_K": w(keys[5], (d_k,)),
        "W_Kimag": w(keys[6], (d_model, d_k)), "b_Kimag": w(keys[7], (d_k,)),
        "W_V": w(keys[8], (d_model, d_v)),     "b_V": w(keys[9], (d_v,)),
        "W_Vimag": w(keys[10], (d_model, d_v)), "b_Vimag": w(keys[11], (d_v,)),
        "W_out": w(keys[12], (d_v, d_model)),  "b_out": w(keys[13], (d_model,)),
    }

    Q = lax.complex(jax.random.normal(keys[14], (bs, q_len, d_model), jnp.float32),
                    jax.random.normal(keys[15], (bs, q_len, d_model), jnp.float32))
    K = lax.complex(jax.random.normal(keys[16], (bs, seq_len, d_model), jnp.float32),
                    jax.random.normal(keys[17], (bs, seq_len, d_model), jnp.float32))
    V = lax.complex(jax.random.normal(keys[18], (bs, seq_len, d_model), jnp.float32),
                    jax.random.normal(keys[19], (bs, seq_len, d_model), jnp.float32))

    fwd = jax.jit(functools.partial(multihead_attention_fu,
                                    kernel_size=kernel_size, stride=stride,
                                    n_heads=n_heads))
    out, attn_w, attn_s = fwd(Q, K, V, params)
    jax.block_until_ready(out)

    ref_out, ref_w, ref_s = reference_forward(
        Q, K, V, params, kernel_size=kernel_size, stride=stride, n_heads=n_heads)

    assert np.allclose(np.asarray(out), np.asarray(ref_out), atol=1e-3, rtol=1e-3)
    assert np.allclose(np.asarray(attn_w), np.asarray(ref_w), atol=1e-3, rtol=1e-3)
    assert np.allclose(np.asarray(attn_s), np.asarray(ref_s), atol=1e-3, rtol=1e-3)
    print("KERNEL_OK")
</pallas_src>

<mosaic_0001>
module attributes {stable_mosaic.version = 11 : i64} {
  func.func @_attn_kernel(%arg0: i32, %arg1: memref<16x64xf32, #tpu.memory_space<vmem>>, %arg2: memref<16x64xf32, #tpu.memory_space<vmem>>, %arg3: memref<16x64xf32, #tpu.memory_space<vmem>>, %arg4: memref<64x64xf32, #tpu.memory_space<vmem>>, %arg5: memref<64x64xf32, #tpu.memory_space<vmem>>, %arg6: memref<64x64xf32, #tpu.memory_space<vmem>>, %arg7: memref<1x64xf32, #tpu.memory_space<vmem>>, %arg8: memref<1x64xf32, #tpu.memory_space<vmem>>, %arg9: memref<1x64xf32, #tpu.memory_space<vmem>>, %arg10: memref<16x128xf32, #tpu.memory_space<vmem>>) attributes {dimension_semantics = [#tpu.dimension_semantics<parallel>], iteration_bounds = array<i64: 1>, scalar_prefetch = 0 : i64, scratch_operands = 0 : i64, tpu.core_type = #tpu.core_type<tc>, window_params = [{transform_indices = @transform_0, window_bounds = array<i64: 16, 64>}, {transform_indices = @transform_1, window_bounds = array<i64: 16, 64>}, {transform_indices = @transform_2, window_bounds = array<i64: 16, 64>}, {pipeline_mode = #tpu.pipeline_mode<synchronous>, transform_indices = @transform_3, window_bounds = array<i64: 64, 64>}, {pipeline_mode = #tpu.pipeline_mode<synchronous>, transform_indices = @transform_4, window_bounds = array<i64: 64, 64>}, {pipeline_mode = #tpu.pipeline_mode<synchronous>, transform_indices = @transform_5, window_bounds = array<i64: 64, 64>}, {pipeline_mode = #tpu.pipeline_mode<synchronous>, transform_indices = @transform_6, window_bounds = array<i64: 1, 64>}, {pipeline_mode = #tpu.pipeline_mode<synchronous>, transform_indices = @transform_7, window_bounds = array<i64: 1, 64>}, {pipeline_mode = #tpu.pipeline_mode<synchronous>, transform_indices = @transform_8, window_bounds = array<i64: 1, 64>}, {transform_indices = @transform_9, window_bounds = array<i64: 16, 128>}]} {
    %c0 = arith.constant 0 : index
    %c0_0 = arith.constant 0 : index
    %0 = vector.load %arg1[%c0, %c0_0] : memref<16x64xf32, #tpu.memory_space<vmem>>, vector<16x64xf32>
    %c0_1 = arith.constant 0 : index
    %c0_2 = arith.constant 0 : index
    %1 = vector.load %arg4[%c0_1, %c0_2] : memref<64x64xf32, #tpu.memory_space<vmem>>, vector<64x64xf32>
    %cst = arith.constant dense<0.000000e+00> : vector<16x64xf32>
    %2 = tpu.matmul %0, %1, %cst {dimension_numbers = #tpu.dot_dimension_numbers<[1], [0], [0], [1], [0, 0, 1, 1], [], []>} : vector<16x64xf32>, vector<64x64xf32>, vector<16x64xf32> -> vector<16x64xf32>
    %c0_3 = arith.constant 0 : index
    %c0_4 = arith.constant 0 : index
    %3 = vector.load %arg7[%c0_3, %c0_4] : memref<1x64xf32, #tpu.memory_space<vmem>>, vector<1x64xf32>
    %4 = vector.broadcast %3 : vector<1x64xf32> to vector<16x64xf32>
    %5 = arith.addf %2, %4 : vector<16x64xf32>
    %c0_5 = arith.constant 0 : index
    %c0_6 = arith.constant 0 : index
    %6 = vector.load %arg2[%c0_5, %c0_6] : memref<16x64xf32, #tpu.memory_space<vmem>>, vector<16x64xf32>
    %c0_7 = arith.constant 0 : index
    %c0_8 = arith.constant 0 : index
    %7 = vector.load %arg5[%c0_7, %c0_8] : memref<64x64xf32, #tpu.memory_space<vmem>>, vector<64x64xf32>
    %cst_9 = arith.constant dense<0.000000e+00> : vector<16x64xf32>
    %8 = tpu.matmul %6, %7, %cst_9 {dimension_numbers = #tpu.dot_dimension_numbers<[1], [0], [0], [1], [0, 0, 1, 1], [], []>} : vector<16x64xf32>, vector<64x64xf32>, vector<16x64xf32> -> vector<16x64xf32>
    %c0_10 = arith.constant 0 : index
    %c0_11 = arith.constant 0 : index
    %9 = vector.load %arg8[%c0_10, %c0_11] : memref<1x64xf32, #tpu.memory_space<vmem>>, vector<1x64xf32>
    %10 = vector.broadcast %9 : vector<1x64xf32> to vector<16x64xf32>
    %11 = arith.addf %8, %10 : vector<16x64xf32>
    %c0_12 = arith.constant 0 : index
    %c0_13 = arith.constant 0 : index
    %12 = vector.load %arg3[%c0_12, %c0_13] : memref<16x64xf32, #tpu.memory_space<vmem>>, vector<16x64xf32>
    %c0_14 = arith.constant 0 : index
    %c0_15 = arith.constant 0 : index
    %13 = vector.load %arg6[%c0_14, %c0_15] : memref<64x64xf32, #tpu.memory_space<vmem>>, vector<64x64xf32>
    %cst_16 = arith.constant dense<0.000000e+00> : vector<16x64xf32>
    %14 = tpu.matmul %12, %13, %cst_16 {dimension_numbers = #tpu.dot_dimension_numbers<[1], [0], [0], [1], [0, 0, 1, 1], [], []>} : vector<16x64xf32>, vector<64x64xf32>, vector<16x64xf32> -> vector<16x64xf32>
    %c0_17 = arith.constant 0 : index
    %c0_18 = arith.constant 0 : index
    %15 = vector.load %arg9[%c0_17, %c0_18] : memref<1x64xf32, #tpu.memory_space<vmem>>, vector<1x64xf32>
    %16 = vector.broadcast %15 : vector<1x64xf32> to vector<16x64xf32>
    %17 = arith.addf %14, %16 : vector<16x64xf32>
    %18 = vector.extract_strided_slice %5 {offsets = [0, 0], sizes = [16, 32], strides = [1, 1]} : vector<16x64xf32> to vector<16x32xf32>
    %19 = vector.extract_strided_slice %5 {offsets = [0, 32], sizes = [16, 32], strides = [1, 1]} : vector<16x64xf32> to vector<16x32xf32>
    %20 = vector.extract_strided_slice %11 {offsets = [0, 0], sizes = [16, 32], strides = [1, 1]} : vector<16x64xf32> to vector<16x32xf32>
    %21 = vector.extract_strided_slice %11 {offsets = [0, 32], sizes = [16, 32], strides = [1, 1]} : vector<16x64xf32> to vector<16x32xf32>
    %22 = vector.extract_strided_slice %17 {offsets = [0, 0], sizes = [16, 32], strides = [1, 1]} : vector<16x64xf32> to vector<16x32xf32>
    %23 = vector.extract_strided_slice %17 {offsets = [0, 32], sizes = [16, 32], strides = [1, 1]} : vector<16x64xf32> to vector<16x32xf32>
    %24 = arith.subf %20, %21 : vector<16x32xf32>
    %25 = arith.addf %21, %20 : vector<16x32xf32>
    %26 = arith.subf %22, %23 : vector<16x32xf32>
    %27 = arith.addf %23, %22 : vector<16x32xf32>
    %28 = tpu.iota {dimensions = array<i32: 1>} : vector<16x8xi32>
    %c7_i32 = arith.constant 7 : i32
    %29 = vector.broadcast %c7_i32 : i32 to vector<16x8xi32>
    %30 = arith.cmpi slt, %28, %29 : vector<16x8xi32>
    %cst_19 = arith.constant 0.000000e+00 : f32
    %31 = vector.broadcast %cst_19 : f32 to vector<8x32xf32>
    %32 = vector.extract_strided_slice %18 {offsets = [0, 0], sizes = [8, 32], strides = [1, 1]} : vector<16x32xf32> to vector<8x32xf32>
    %33 = vector.extract_strided_slice %19 {offsets = [0, 0], sizes = [8, 32], strides = [1, 1]} : vector<16x32xf32> to vector<8x32xf32>
    %34 = vector.extract_strided_slice %24 {offsets = [0, 0], sizes = [8, 32], strides = [1, 1]} : vector<16x32xf32> to vector<8x32xf32>
    %35 = vector.extract_strided_slice %25 {offsets = [0, 0], sizes = [8, 32], strides = [1, 1]} : vector<16x32xf32> to vector<8x32xf32>
    %36 = vector.extract_strided_slice %26 {offsets = [0, 0], sizes = [8, 32], strides = [1, 1]} : vector<16x32xf32> to vector<8x32xf32>
    %37 = vector.extract_strided_slice %27 {offsets = [0, 0], sizes = [8, 32], strides = [1, 1]} : vector<16x32xf32> to vector<8x32xf32>
    %38 = tpu.concatenate %32, %33 in 0 : vector<8x32xf32>, vector<8x32xf32> -> vector<16x32xf32>
    %39 = tpu.concatenate %34, %35 in 0 : vector<8x32xf32>, vector<8x32xf32> -> vector<16x32xf32>
    %cst_20 = arith.constant dense<0.000000e+00> : vector<16x16xf32>
    %40 = tpu.matmul %38, %39, %cst_20 {dimension_numbers = #tpu.dot_dimension_numbers<[1], [1], [0], [0], [0, 0, 1, 0], [], []>} : vector<16x32xf32>, vector<16x32xf32>, vector<16x16xf32> -> vector<16x16xf32>
    %cst_21 = arith.constant 0.176776692 : f32
    %41 = vector.broadcast %cst_21 : f32 to vector<16x16xf32>
    %42 = arith.mulf %40, %41 : vector<16x16xf32>
    %43 = vector.extract_strided_slice %42 {offsets = [0, 0], sizes = [16, 8], strides = [1, 1]} : vector<16x16xf32> to vector<16x8xf32>
    %44 = vector.extract_strided_slice %42 {offsets = [0, 8], sizes = [16, 8], strides = [1, 1]} : vector<16x16xf32> to vector<16x8xf32>
    %cst_22 = arith.constant -1.000000e+30 : f32
    %45 = vector.broadcast %cst_22 : f32 to vector<16x8xf32>
    %46 = arith.select %30, %43, %45 : vector<16x8xi1>, vector<16x8xf32>
    %cst_23 = arith.constant dense<0xFF800000> : vector<16xf32>
    %47 = vector.multi_reduction <maximumf>, %46, %cst_23 [1] : vector<16x8xf32> to vector<16xf32>
    %48 = vector.shape_cast %47 : vector<16xf32> to vector<16x1xf32>
    %49 = vector.broadcast %48 : vector<16x1xf32> to vector<16x8xf32>
    %50 = arith.subf %46, %49 : vector<16x8xf32>
    %51 = math.exp %50 : vector<16x8xf32>
    %cst_24 = arith.constant 0.000000e+00 : f32
    %52 = vector.broadcast %cst_24 : f32 to vector<16x8xf32>
    %53 = arith.select %30, %51, %52 : vector<16x8xi1>, vector<16x8xf32>
    %cst_25 = arith.constant dense<0.000000e+00> : vector<16xf32>
    %54 = vector.multi_reduction <add>, %53, %cst_25 [1] : vector<16x8xf32> to vector<16xf32>
    %55 = vector.shape_cast %54 : vector<16xf32> to vector<16x1xf32>
    %56 = tpu.reciprocal %55 : vector<16x1xf32> -> vector<16x1xf32>
    %57 = vector.broadcast %56 : vector<16x1xf32> to vector<16x8xf32>
    %58 = arith.mulf %53, %57 : vector<16x8xf32>
    %cst_26 = arith.constant -1.000000e+30 : f32
    %59 = vector.broadcast %cst_26 : f32 to vector<16x8xf32>
    %60 = arith.select %30, %44, %59 : vector<16x8xi1>, vector<16x8xf32>
    %cst_27 = arith.constant dense<0xFF800000> : vector<16xf32>
    %61 = vector.multi_reduction <maximumf>, %60, %cst_27 [1] : vector<16x8xf32> to vector<16xf32>
    %62 = vector.shape_cast %61 : vector<16xf32> to vector<16x1xf32>
    %63 = vector.broadcast %62 : vector<16x1xf32> to vector<16x8xf32>
    %64 = arith.subf %60, %63 : vector<16x8xf32>
    %65 = math.exp %64 : vector<16x8xf32>
    %cst_28 = arith.constant 0.000000e+00 : f32
    %66 = vector.broadcast %cst_28 : f32 to vector<16x8xf32>
    %67 = arith.select %30, %65, %66 : vector<16x8xi1>, vector<16x8xf32>
    %cst_29 = arith.constant dense<0.000000e+00> : vector<16xf32>
    %68 = vector.multi_reduction <add>, %67, %cst_29 [1] : vector<16x8xf32> to vector<16xf32>
    %69 = vector.shape_cast %68 : vector<16xf32> to vector<16x1xf32>
    %70 = tpu.reciprocal %69 : vector<16x1xf32> -> vector<16x1xf32>
    %71 = vector.broadcast %70 : vector<16x1xf32> to vector<16x8xf32>
    %72 = arith.mulf %67, %71 : vector<16x8xf32>
    %73 = vector.extract_strided_slice %43 {offsets = [0, 0], sizes = [8, 8], strides = [1, 1]} : vector<16x8xf32> to vector<8x8xf32>
    %74 = vector.extract_strided_slice %43 {offsets = [8, 0], sizes = [8, 8], strides = [1, 1]} : vector<16x8xf32> to vector<8x8xf32>
    %75 = vector.extract_strided_slice %44 {offsets = [0, 0], sizes = [8, 8], strides = [1, 1]} : vector<16x8xf32> to vector<8x8xf32>
    %76 = vector.extract_strided_slice %44 {offsets = [8, 0], sizes = [8, 8], strides = [1, 1]} : vector<16x8xf32> to vector<8x8xf32>
    %77 = vector.extract_strided_slice %58 {offsets = [0, 0], sizes = [8, 8], strides = [1, 1]} : vector<16x8xf32> to vector<8x8xf32>
    %78 = vector.extract_strided_slice %58 {offsets = [8, 0], sizes = [8, 8], strides = [1, 1]} : vector<16x8xf32> to vector<8x8xf32>
    %79 = vector.extract_strided_slice %72 {offsets = [0, 0], sizes = [8, 8], strides = [1, 1]} : vector<16x8xf32> to vector<8x8xf32>
    %80 = vector.extract_strided_slice %72 {offsets = [8, 0], sizes = [8, 8], strides = [1, 1]} : vector<16x8xf32> to vector<8x8xf32>
    %81 = arith.subf %73, %75 : vector<8x8xf32>
    %82 = arith.subf %81, %74 : vector<8x8xf32>
    %83 = arith.subf %82, %76 : vector<8x8xf32>
    %84 = arith.addf %73, %75 : vector<8x8xf32>
    %85 = arith.addf %84, %74 : vector<8x8xf32>
    %86 = arith.subf %85, %76 : vector<8x8xf32>
    %87 = arith.subf %77, %79 : vector<8x8xf32>
    %88 = arith.subf %87, %78 : vector<8x8xf32>
    %89 = arith.subf %88, %80 : vector<8x8xf32>
    %90 = arith.addf %77, %79 : vector<8x8xf32>
    %91 = arith.addf %90, %78 : vector<8x8xf32>
    %92 = arith.subf %91, %80 : vector<8x8xf32>
    %93 = arith.subf %77, %80 : vector<8x8xf32>
    %94 = arith.addf %79, %78 : vector<8x8xf32>
    %95 = tpu.concatenate %93, %94 in 0 : vector<8x8xf32>, vector<8x8xf32> -> vector<16x8xf32>
    %96 = tpu.concatenate %36, %37 in 1 : vector<8x32xf32>, vector<8x32xf32> -> vector<8x64xf32>
    %cst_30 = arith.constant dense<0.000000e+00> : vector<16x64xf32>
    %97 = tpu.matmul %95, %96, %cst_30 {dimension_numbers = #tpu.dot_dimension_numbers<[1], [0], [0], [1], [0, 0, 1, 1], [], []>} : vector<16x8xf32>, vector<8x64xf32>, vector<16x64xf32> -> vector<16x64xf32>
    %98 = vector.extract_strided_slice %97 {offsets = [0, 0], sizes = [8, 32], strides = [1, 1]} : vector<16x64xf32> to vector<8x32xf32>
    %99 = vector.extract_strided_slice %97 {offsets = [8, 32], sizes = [8, 32], strides = [1, 1]} : vector<16x64xf32> to vector<8x32xf32>
    %100 = arith.subf %98, %99 : vector<8x32xf32>
    %101 = vector.extract_strided_slice %97 {offsets = [0, 32], sizes = [8, 32], strides = [1, 1]} : vector<16x64xf32> to vector<8x32xf32>
    %102 = vector.extract_strided_slice %97 {offsets = [8, 0], sizes = [8, 32], strides = [1, 1]} : vector<16x64xf32> to vector<8x32xf32>
    %103 = arith.addf %101, %102 : vector<8x32xf32>
    %104 = tpu.concatenate %100, %103, %89, %92, %83, %86, %31 in 1 : vector<8x32xf32>, vector<8x32xf32>, vector<8x8xf32>, vector<8x8xf32>, vector<8x8xf32>, vector<8x8xf32>, vector<8x32xf32> -> vector<8x128xf32>
    %c0_31 = arith.constant 0 : index
    %c0_32 = arith.constant 0 : index
    %105 = vector.load %arg10[%c0_31, %c0_32] : memref<16x128xf32, #tpu.memory_space<vmem>>, vector<8x128xf32>
    tpu.vector_store %arg10[%c0_31, %c0_32], %104 {strides = array<i32>} : memref<16x128xf32, #tpu.memory_space<vmem>>, vector<8x128xf32>,
    %106 = vector.extract_strided_slice %18 {offsets = [8, 0], sizes = [8, 32], strides = [1, 1]} : vector<16x32xf32> to vector<8x32xf32>
    %107 = vector.extract_strided_slice %19 {offsets = [8, 0], sizes = [8, 32], strides = [1, 1]} : vector<16x32xf32> to vector<8x32xf32>
    %108 = vector.extract_strided_slice %24 {offsets = [8, 0], sizes = [8, 32], strides = [1, 1]} : vector<16x32xf32> to vector<8x32xf32>
    %109 = vector.extract_strided_slice %25 {offsets = [8, 0], sizes = [8, 32], strides = [1, 1]} : vector<16x32xf32> to vector<8x32xf32>
    %110 = vector.extract_strided_slice %26 {offsets = [8, 0], sizes = [8, 32], strides = [1, 1]} : vector<16x32xf32> to vector<8x32xf32>
    %111 = vector.extract_strided_slice %27 {offsets = [8, 0], sizes = [8, 32], strides = [1, 1]} : vector<16x32xf32> to vector<8x32xf32>
    %112 = tpu.concatenate %106, %107 in 0 : vector<8x32xf32>, vector<8x32xf32> -> vector<16x32xf32>
    %113 = tpu.concatenate %108, %109 in 0 : vector<8x32xf32>, vector<8x32xf32> -> vector<16x32xf32>
    %cst_33 = arith.constant dense<0.000000e+00> : vector<16x16xf32>
    %114 = tpu.matmul %112, %113, %cst_33 {dimension_numbers = #tpu.dot_dimension_numbers<[1], [1], [0], [0], [0, 0, 1, 0], [], []>} : vector<16x32xf32>, vector<16x32xf32>, vector<16x16xf32> -> vector<16x16xf32>
    %cst_34 = arith.constant 0.176776692 : f32
    %115 = vector.broadcast %cst_34 : f32 to vector<16x16xf32>
    %116 = arith.mulf %114, %115 : vector<16x16xf32>
    %117 = vector.extract_strided_slice %116 {offsets = [0, 0], sizes = [16, 8], strides = [1, 1]} : vector<16x16xf32> to vector<16x8xf32>
    %118 = vector.extract_strided_slice %116 {offsets = [0, 8], sizes = [16, 8], strides = [1, 1]} : vector<16x16xf32> to vector<16x8xf32>
    %cst_35 = arith.constant -1.000000e+30 : f32
    %119 = vector.broadcast %cst_35 : f32 to vector<16x8xf32>
    %120 = arith.select %30, %117, %119 : vector<16x8xi1>, vector<16x8xf32>
    %cst_36 = arith.constant dense<0xFF800000> : vector<16xf32>
    %121 = vector.multi_reduction <maximumf>, %120, %cst_36 [1] : vector<16x8xf32> to vector<16xf32>
    %122 = vector.shape_cast %121 : vector<16xf32> to vector<16x1xf32>
    %123 = vector.broadcast %122 : vector<16x1xf32> to vector<16x8xf32>
    %124 = arith.subf %120, %123 : vector<16x8xf32>
    %125 = math.exp %124 : vector<16x8xf32>
    %cst_37 = arith.constant 0.000000e+00 : f32
    %126 = vector.broadcast %cst_37 : f32 to vector<16x8xf32>
    %127 = arith.select %30, %125, %126 : vector<16x8xi1>, vector<16x8xf32>
    %cst_38 = arith.constant dense<0.000000e+00> : vector<16xf32>
    %128 = vector.multi_reduction <add>, %127, %cst_38 [1] : vector<16x8xf32> to vector<16xf32>
    %129 = vector.shape_cast %128 : vector<16xf32> to vector<16x1xf32>
    %130 = tpu.reciprocal %129 : vector<16x1xf32> -> vector<16x1xf32>
    %131 = vector.broadcast %130 : vector<16x1xf32> to vector<16x8xf32>
    %132 = arith.mulf %127, %131 : vector<16x8xf32>
    %cst_39 = arith.constant -1.000000e+30 : f32
    %133 = vector.broadcast %cst_39 : f32 to vector<16x8xf32>
    %134 = arith.select %30, %118, %133 : vector<16x8xi1>, vector<16x8xf32>
    %cst_40 = arith.constant dense<0xFF800000> : vector<16xf32>
    %135 = vector.multi_reduction <maximumf>, %134, %cst_40 [1] : vector<16x8xf32> to vector<16xf32>
    %136 = vector.shape_cast %135 : vector<16xf32> to vector<16x1xf32>
    %137 = vector.broadcast %136 : vector<16x1xf32> to vector<16x8xf32>
    %138 = arith.subf %134, %137 : vector<16x8xf32>
    %139 = math.exp %138 : vector<16x8xf32>
    %cst_41 = arith.constant 0.000000e+00 : f32
    %140 = vector.broadcast %cst_41 : f32 to vector<16x8xf32>
    %141 = arith.select %30, %139, %140 : vector<16x8xi1>, vector<16x8xf32>
    %cst_42 = arith.constant dense<0.000000e+00> : vector<16xf32>
    %142 = vector.multi_reduction <add>, %141, %cst_42 [1] : vector<16x8xf32> to vector<16xf32>
    %143 = vector.shape_cast %142 : vector<16xf32> to vector<16x1xf32>
    %144 = tpu.reciprocal %143 : vector<16x1xf32> -> vector<16x1xf32>
    %145 = vector.broadcast %144 : vector<16x1xf32> to vector<16x8xf32>
    %146 = arith.mulf %141, %145 : vector<16x8xf32>
    %147 = vector.extract_strided_slice %117 {offsets = [0, 0], sizes = [8, 8], strides = [1, 1]} : vector<16x8xf32> to vector<8x8xf32>
    %148 = vector.extract_strided_slice %117 {offsets = [8, 0], sizes = [8, 8], strides = [1, 1]} : vector<16x8xf32> to vector<8x8xf32>
    %149 = vector.extract_strided_slice %118 {offsets = [0, 0], sizes = [8, 8], strides = [1, 1]} : vector<16x8xf32> to vector<8x8xf32>
    %150 = vector.extract_strided_slice %118 {offsets = [8, 0], sizes = [8, 8], strides = [1, 1]} : vector<16x8xf32> to vector<8x8xf32>
    %151 = vector.extract_strided_slice %132 {offsets = [0, 0], sizes = [8, 8], strides = [1, 1]} : vector<16x8xf32> to vector<8x8xf32>
    %152 = vector.extract_strided_slice %132 {offsets = [8, 0], sizes = [8, 8], strides = [1, 1]} : vector<16x8xf32> to vector<8x8xf32>
    %153 = vector.extract_strided_slice %146 {offsets = [0, 0], sizes = [8, 8], strides = [1, 1]} : vector<16x8xf32> to vector<8x8xf32>
    %154 = vector.extract_strided_slice %146 {offsets = [8, 0], sizes = [8, 8], strides = [1, 1]} : vector<16x8xf32> to vector<8x8xf32>
    %155 = arith.subf %147, %149 : vector<8x8xf32>
    %156 = arith.subf %155, %148 : vector<8x8xf32>
    %157 = arith.subf %156, %150 : vector<8x8xf32>
    %158 = arith.addf %147, %149 : vector<8x8xf32>
    %159 = arith.addf %158, %148 : vector<8x8xf32>
    %160 = arith.subf %159, %150 : vector<8x8xf32>
    %161 = arith.subf %151, %153 : vector<8x8xf32>
    %162 = arith.subf %161, %152 : vector<8x8xf32>
    %163 = arith.subf %162, %154 : vector<8x8xf32>
    %164 = arith.addf %151, %153 : vector<8x8xf32>
    %165 = arith.addf %164, %152 : vector<8x8xf32>
    %166 = arith.subf %165, %154 : vector<8x8xf32>
    %167 = arith.subf %151, %154 : vector<8x8xf32>
    %168 = arith.addf %153, %152 : vector<8x8xf32>
    %169 = tpu.concatenate %167, %168 in 0 : vector<8x8xf32>, vector<8x8xf32> -> vector<16x8xf32>
    %170 = tpu.concatenate %110, %111 in 1 : vector<8x32xf32>, vector<8x32xf32> -> vector<8x64xf32>
    %cst_43 = arith.constant dense<0.000000e+00> : vector<16x64xf32>
    %171 = tpu.matmul %169, %170, %cst_43 {dimension_numbers = #tpu.dot_dimension_numbers<[1], [0], [0], [1], [0, 0, 1, 1], [], []>} : vector<16x8xf32>, vector<8x64xf32>, vector<16x64xf32> -> vector<16x64xf32>
    %172 = vector.extract_strided_slice %171 {offsets = [0, 0], sizes = [8, 32], strides = [1, 1]} : vector<16x64xf32> to vector<8x32xf32>
    %173 = vector.extract_strided_slice %171 {offsets = [8, 32], sizes = [8, 32], strides = [1, 1]} : vector<16x64xf32> to vector<8x32xf32>
    %174 = arith.subf %172, %173 : vector<8x32xf32>
    %175 = vector.extract_strided_slice %171 {offsets = [0, 32], sizes = [8, 32], strides = [1, 1]} : vector<16x64xf32> to vector<8x32xf32>
    %176 = vector.extract_strided_slice %171 {offsets = [8, 0], sizes = [8, 32], strides = [1, 1]} : vector<16x64xf32> to vector<8x32xf32>
    %177 = arith.addf %175, %176 : vector<8x32xf32>
    %178 = tpu.concatenate %174, %177, %163, %166, %157, %160, %31 in 1 : vector<8x32xf32>, vector<8x32xf32>, vector<8x8xf32>, vector<8x8xf32>, vector<8x8xf32>, vector<8x8xf32>, vector<8x32xf32> -> vector<8x128xf32>
    %c8 = arith.constant 8 : index
    %c0_44 = arith.constant 0 : index
    %179 = vector.load %arg10[%c8, %c0_44] : memref<16x128xf32, #tpu.memory_space<vmem>>, vector<8x128xf32>
    tpu.vector_store %arg10[%c8, %c0_44], %178 {strides = array<i32>} : memref<16x128xf32, #tpu.memory_space<vmem>>, vector<8x128xf32>,
    return
  }
  func.func @transform_0(%arg0: i32) -> (i32, i32) {
    %c0_i32 = arith.constant 0 : i32
    %c0_i32_0 = arith.constant 0 : i32
    return %arg0, %c0_i32 : i32, i32
  }
  func.func @transform_1(%arg0: i32) -> (i32, i32) {
    %c0_i32 = arith.constant 0 : i32
    %c0_i32_0 = arith.constant 0 : i32
    return %arg0, %c0_i32 : i32, i32
  }
  func.func @transform_2(%arg0: i32) -> (i32, i32) {
    %c0_i32 = arith.constant 0 : i32
    %c0_i32_0 = arith.constant 0 : i32
    return %arg0, %c0_i32 : i32, i32
  }
  func.func @transform_3(%arg0: i32) -> (i32, i32) {
    %c0_i32 = arith.constant 0 : i32
    %c0_i32_0 = arith.constant 0 : i32
    %c0_i32_1 = arith.constant 0 : i32
    return %c0_i32, %c0_i32_0 : i32, i32
  }
  func.func @transform_4(%arg0: i32) -> (i32, i32) {
    %c0_i32 = arith.constant 0 : i32
    %c0_i32_0 = arith.constant 0 : i32
    %c0_i32_1 = arith.constant 0 : i32
    return %c0_i32, %c0_i32_0 : i32, i32
  }
  func.func @transform_5(%arg0: i32) -> (i32, i32) {
    %c0_i32 = arith.constant 0 : i32
    %c0_i32_0 = arith.constant 0 : i32
    %c0_i32_1 = arith.constant 0 : i32
    return %c0_i32, %c0_i32_0 : i32, i32
  }
  func.func @transform_6(%arg0: i32) -> (i32, i32) {
    %c0_i32 = arith.constant 0 : i32
    %c0_i32_0 = arith.constant 0 : i32
    %c0_i32_1 = arith.constant 0 : i32
    return %c0_i32, %c0_i32_0 : i32, i32
  }
  func.func @transform_7(%arg0: i32) -> (i32, i32) {
    %c0_i32 = arith.constant 0 : i32
    %c0_i32_0 = arith.constant 0 : i32
    %c0_i32_1 = arith.constant 0 : i32
    return %c0_i32, %c0_i32_0 : i32, i32
  }
  func.func @transform_8(%arg0: i32) -> (i32, i32) {
    %c0_i32 = arith.constant 0 : i32
    %c0_i32_0 = arith.constant 0 : i32
    %c0_i32_1 = arith.constant 0 : i32
    return %c0_i32, %c0_i32_0 : i32, i32
  }
  func.func @transform_9(%arg0: i32) -> (i32, i32) {
    %c0_i32 = arith.constant 0 : i32
    %c0_i32_0 = arith.constant 0 : i32
    return %arg0, %c0_i32 : i32, i32
  }
}

module attributes {stable_mosaic.version = 11 : i64} {
  func.func @_to_out_kernel(%arg0: i32, %arg1: memref<32x32xf32, #tpu.memory_space<vmem>>, %arg2: memref<32x32xf32, #tpu.memory_space<vmem>>, %arg3: memref<1x32xf32, #tpu.memory_space<vmem>>, %arg4: memref<16x128xf32, #tpu.memory_space<vmem>>) attributes {dimension_semantics = [#tpu.dimension_semantics<arbitrary>], iteration_bounds = array<i64: 1>, scalar_prefetch = 0 : i64, scratch_operands = 0 : i64, tpu.core_type = #tpu.core_type<tc>, window_params = [{pipeline_mode = #tpu.pipeline_mode<synchronous>, transform_indices = @transform_0, window_bounds = array<i64: 32, 32>}, {pipeline_mode = #tpu.pipeline_mode<synchronous>, transform_indices = @transform_1, window_bounds = array<i64: 32, 32>}, {pipeline_mode = #tpu.pipeline_mode<synchronous>, transform_indices = @transform_2, window_bounds = array<i64: 1, 32>}, {pipeline_mode = #tpu.pipeline_mode<synchronous>, transform_indices = @transform_3, window_bounds = array<i64: 16, 128>}]} {
    %c0 = arith.constant 0 : index
    %c0_0 = arith.constant 0 : index
    %0 = vector.load %arg1[%c0, %c0_0] : memref<32x32xf32, #tpu.memory_space<vmem>>, vector<32x32xf32>
    %c0_1 = arith.constant 0 : index
    %c0_2 = arith.constant 0 : index
    %1 = vector.load %arg2[%c0_1, %c0_2] : memref<32x32xf32, #tpu.memory_space<vmem>>, vector<32x32xf32>
    %cst = arith.constant dense<0.000000e+00> : vector<32x32xf32>
    %2 = tpu.matmul %0, %1, %cst {dimension_numbers = #tpu.dot_dimension_numbers<[1], [0], [0], [1], [0, 0, 1, 1], [], []>} : vector<32x32xf32>, vector<32x32xf32>, vector<32x32xf32> -> vector<32x32xf32>
    %c0_3 = arith.constant 0 : index
    %c0_4 = arith.constant 0 : index
    %3 = vector.load %arg3[%c0_3, %c0_4] : memref<1x32xf32, #tpu.memory_space<vmem>>, vector<1x32xf32>
    %4 = vector.broadcast %3 : vector<1x32xf32> to vector<32x32xf32>
    %5 = arith.addf %2, %4 : vector<32x32xf32>
    %6 = vector.extract_strided_slice %5 {offsets = [0, 0], sizes = [16, 32], strides = [1, 1]} : vector<32x32xf32> to vector<16x32xf32>
    %7 = vector.extract_strided_slice %5 {offsets = [16, 0], sizes = [16, 32], strides = [1, 1]} : vector<32x32xf32> to vector<16x32xf32>
    %8 = arith.subf %6, %7 : vector<16x32xf32>
    %9 = arith.addf %6, %7 : vector<16x32xf32>
    %cst_5 = arith.constant 0.000000e+00 : f32
    %10 = vector.broadcast %cst_5 : f32 to vector<16x64xf32>
    %11 = tpu.concatenate %8, %9, %10 in 1 : vector<16x32xf32>, vector<16x32xf32>, vector<16x64xf32> -> vector<16x128xf32>
    %c0_6 = arith.constant 0 : index
    %c0_7 = arith.constant 0 : index
    %12 = vector.load %arg4[%c0_6, %c0_7] : memref<16x128xf32, #tpu.memory_space<vmem>>, vector<16x128xf32>
    tpu.vector_store %arg4[%c0_6, %c0_7], %11 {strides = array<i32>} : memref<16x128xf32, #tpu.memory_space<vmem>>, vector<16x128xf32>,
    return
  }
  func.func @transform_0(%arg0: i32) -> (i32, i32) {
    %c0_i32 = arith.constant 0 : i32
    %c0_i32_0 = arith.constant 0 : i32
    %c0_i32_1 = arith.constant 0 : i32
    return %c0_i32, %c0_i32_0 : i32, i32
  }
  func.func @transform_1(%arg0: i32) -> (i32, i32) {
    %c0_i32 = arith.constant 0 : i32
    %c0_i32_0 = arith.constant 0 : i32
    %c0_i32_1 = arith.constant 0 : i32
    return %c0_i32, %c0_i32_0 : i32, i32
  }
  func.func @transform_2(%arg0: i32) -> (i32, i32) {
    %c0_i32 = arith.constant 0 : i32
    %c0_i32_0 = arith.constant 0 : i32
    %c0_i32_1 = arith.constant 0 : i32
    return %c0_i32, %c0_i32_0 : i32, i32
  }
  func.func @transform_3(%arg0: i32) -> (i32, i32) {
    %c0_i32 = arith.constant 0 : i32
    %c0_i32_0 = arith.constant 0 : i32
    %c0_i32_1 = arith.constant 0 : i32
    return %c0_i32, %c0_i32_0 : i32, i32
  }
}

</mosaic_0001>

<bundles_post_ra>
// kernel: custom-call.1
= control target key start
LH: loop header
LB: loop body
LE: loop exit
PB: predicated region body
PF: predicated region fallthrough
CT: control target
= control target key end

     0   :  { %s59_s0 = inlined_call_operand.hbm [shape: c64[2,8,32], index: 0, kind: input, shape index: {}]   ;;  %s60_s1 = inlined_call_operand.vmem [shape: f32[2,8,32], index: 1, kind: output, shape index: {}]  }
   0x1   :  { %s2_s8 = scalar_lea.hbm %s59_s0, 256 }
   0x2   :  { %3 = vsyncpa [#allocation0], 0  ;;  %s4_s11 = sshll.u32 %s60_s1, 4  ;;  %s34_s14 = scalar_lea.hbm %s59_s0, 512  ;;  %s5_s11 = int_to_ptr.vmem [resolvable:$true] %s4_s11 }
   0x3   :  { %p11_p0 = scmp.ne.s32.totalorder %s2_s8, %s34_s14  ;;  %p13_p1 = scmp.lt.u32.totalorder %s2_s8, %s59_s0 }
   0x4   :  { %p14_p2 = scmp.lt.u32.totalorder %s34_s14, %s34_s14  ;;  %p16_p4 = scmp.lt.u32.totalorder %s34_s14, %s2_s8 }
   0x6   :  { %p15_p3 = por %p14_p2, %p13_p1 }
   0x8   :  { %p17_p5 = por %p16_p4, %p15_p3 }
   0xa   :  { %p18_p6 = pnand %p17_p5, %p11_p0 }
   0xc   :  { %21 = shalt.err (!%p18_p6)  }
   0xd   :  { %s22_s17 = scalar_lea.vmem %s5_s11, 256  ;;  %p27_p8 = scmp.lt.s32.totalorder %s5_s11, %s5_s11 }
   0xe   :  { %p23_p7 = scmp.ne.s32.totalorder %s5_s11, %s22_s17  ;;  %p28_p9 = scmp.lt.s32.totalorder %s22_s17, %s22_s17 }
  0x10   :  { %p29_p10 = por %p28_p9, %p27_p8 }
  0x12   :  { %p30_p11 = pnand %p29_p10, %p23_p7 }
  0x14   :  { %33 = shalt.err (!%p30_p11)  }
  0x15   :  { %7 = dma.hbm_to_vmem [thread:$0]  %s2_s8, 256, %s5_s11, [#allocation0] }
  0x16   :  { %35 = dma.done.wait [#allocation0], 256  }
  0x17   :  { %36 = vsyncadd [#allocation0], 4294967040 }
  0x18   :  { %9 = vsyncpa [#allocation0], 1 }

// kernel: custom-call
= control target key start
LH: loop header
LB: loop body
LE: loop exit
PB: predicated region body
PF: predicated region fallthrough
CT: control target
= control target key end

     0   :  { %2 = vsyncpa [#allocation0], 0  ;;  %s61_s0 = inlined_call_operand.hbm [shape: c64[2,8,32], index: 0, kind: input, shape index: {}]   ;;  %s62_s1 = inlined_call_operand.vmem [shape: f32[2,8,32], index: 1, kind: output, shape index: {}]  }
   0x1   :  { %s3_s8 = sshll.u32 %s62_s1, 4  ;;  %s9_s11 = scalar_lea.hbm %s61_s0, 256  ;;  %s4_s8 = int_to_ptr.vmem [resolvable:$true] %s3_s8 }
   0x2   :  { %p10_p0 = scmp.ne.s32.totalorder %s61_s0, %s9_s11  ;;  %s11_s16 = scalar_lea.hbm %s61_s0, 512 }
   0x3   :  { %p12_p1 = scmp.lt.u32.totalorder %s11_s16, %s9_s11  ;;  %p13_p2 = scmp.lt.u32.totalorder %s9_s11, %s61_s0 }
   0x5   :  { %p14_p3 = por %p13_p2, %p12_p1 }
   0x7   :  { %p15_p4 = pnand %p14_p3, %p10_p0 }
   0x9   :  { %18 = shalt.err (!%p15_p4)  }
   0xa   :  { %s19_s1 = scalar_lea.vmem %s4_s8, 256  ;;  %p24_p6 = scmp.lt.s32.totalorder %s4_s8, %s4_s8 }
   0xb   :  { %p20_p5 = scmp.ne.s32.totalorder %s4_s8, %s19_s1  ;;  %p25_p7 = scmp.lt.s32.totalorder %s19_s1, %s19_s1 }
   0xd   :  { %p26_p8 = por %p25_p7, %p24_p6 }
   0xf   :  { %p27_p9 = pnand %p26_p8, %p20_p5 }
  0x11   :  { %30 = shalt.err (!%p27_p9)  }
  0x12   :  { %6 = dma.hbm_to_vmem [thread:$0]  %s61_s0, 256, %s4_s8, [#allocation0] }
  0x13   :  { %31 = dma.done.wait [#allocation0], 256  }
  0x14   :  { %32 = vsyncadd [#allocation0], 4294967040 }
  0x15   :  { %8 = vsyncpa [#allocation0], 1 }

// kernel: custom-call.3
= control target key start
LH: loop header
LB: loop body
LE: loop exit
PB: predicated region body
PF: predicated region fallthrough
CT: control target
= control target key end

     0   :  { %s59_s0 = inlined_call_operand.hbm [shape: c64[2,16,32], index: 0, kind: input, shape index: {}]   ;;  %s60_s1 = inlined_call_operand.vmem [shape: f32[2,16,32], index: 1, kind: output, shape index: {}]  }
   0x1   :  { %s2_s8 = scalar_lea.hbm %s59_s0, 512 }
   0x2   :  { %3 = vsyncpa [#allocation0], 0  ;;  %s4_s11 = sshll.u32 %s60_s1, 4  ;;  %s34_s14 = scalar_lea.hbm %s59_s0, 1024  ;;  %s5_s11 = int_to_ptr.vmem [resolvable:$true] %s4_s11 }
   0x3   :  { %p11_p0 = scmp.ne.s32.totalorder %s2_s8, %s34_s14  ;;  %p13_p1 = scmp.lt.u32.totalorder %s2_s8, %s59_s0 }
   0x4   :  { %p14_p2 = scmp.lt.u32.totalorder %s34_s14, %s34_s14  ;;  %p16_p4 = scmp.lt.u32.totalorder %s34_s14, %s2_s8 }
   0x6   :  { %p15_p3 = por %p14_p2, %p13_p1 }
   0x8   :  { %p17_p5 = por %p16_p4, %p15_p3 }
   0xa   :  { %p18_p6 = pnand %p17_p5, %p11_p0 }
   0xc   :  { %21 = shalt.err (!%p18_p6)  }
   0xd   :  { %s22_s17 = scalar_lea.vmem %s5_s11, 512  ;;  %p27_p8 = scmp.lt.s32.totalorder %s5_s11, %s5_s11 }
   0xe   :  { %p23_p7 = scmp.ne.s32.totalorder %s5_s11, %s22_s17  ;;  %p28_p9 = scmp.lt.s32.totalorder %s22_s17, %s22_s17 }
  0x10   :  { %p29_p10 = por %p28_p9, %p27_p8 }
  0x12   :  { %p30_p11 = pnand %p29_p10, %p23_p7 }
  0x14   :  { %33 = shalt.err (!%p30_p11)  }
  0x15   :  { %7 = dma.hbm_to_vmem [thread:$0]  %s2_s8, 512, %s5_s11, [#allocation0] }
  0x16   :  { %35 = dma.done.wait [#allocation0], 512  }
  0x17   :  { %36 = vsyncadd [#allocation0], 4294966784 }
  0x18   :  { %9 = vsyncpa [#allocation0], 1 }

// kernel: custom-call.2
= control target key start
LH: loop header
LB: loop body
LE: loop exit
PB: predicated region body
PF: predicated region fallthrough
CT: control target
= control target key end

     0   :  { %2 = vsyncpa [#allocation0], 0  ;;  %s61_s0 = inlined_call_operand.hbm [shape: c64[2,16,32], index: 0, kind: input, shape index: {}]   ;;  %s62_s1 = inlined_call_operand.vmem [shape: f32[2,16,32], index: 1, kind: output, shape index: {}]  }
   0x1   :  { %s3_s8 = sshll.u32 %s62_s1, 4  ;;  %s9_s11 = scalar_lea.hbm %s61_s0, 512  ;;  %s4_s8 = int_to_ptr.vmem [resolvable:$true] %s3_s8 }
   0x2   :  { %p10_p0 = scmp.ne.s32.totalorder %s61_s0, %s9_s11  ;;  %s11_s16 = scalar_lea.hbm %s61_s0, 1024 }
   0x3   :  { %p12_p1 = scmp.lt.u32.totalorder %s11_s16, %s9_s11  ;;  %p13_p2 = scmp.lt.u32.totalorder %s9_s11, %s61_s0 }
   0x5   :  { %p14_p3 = por %p13_p2, %p12_p1 }
   0x7   :  { %p15_p4 = pnand %p14_p3, %p10_p0 }
   0x9   :  { %18 = shalt.err (!%p15_p4)  }
   0xa   :  { %s19_s1 = scalar_lea.vmem %s4_s8, 512  ;;  %p24_p6 = scmp.lt.s32.totalorder %s4_s8, %s4_s8 }
   0xb   :  { %p20_p5 = scmp.ne.s32.totalorder %s4_s8, %s19_s1  ;;  %p25_p7 = scmp.lt.s32.totalorder %s19_s1, %s19_s1 }
   0xd   :  { %p26_p8 = por %p25_p7, %p24_p6 }
   0xf   :  { %p27_p9 = pnand %p26_p8, %p20_p5 }
  0x11   :  { %30 = shalt.err (!%p27_p9)  }
  0x12   :  { %6 = dma.hbm_to_vmem [thread:$0]  %s61_s0, 512, %s4_s8, [#allocation0] }
  0x13   :  { %31 = dma.done.wait [#allocation0], 512  }
  0x14   :  { %32 = vsyncadd [#allocation0], 4294966784 }
  0x15   :  { %8 = vsyncpa [#allocation0], 1 }

// kernel: neg.3
= control target key start
LH: loop header
LB: loop body
LE: loop exit
PB: predicated region body
PF: predicated region fallthrough
CT: control target
= control target key end

     0   :  { %s72_s0 = inlined_call_operand.vmem [shape: f32[32,32], index: 0, kind: input, shape index: {}]   ;;  %s73_s1 = inlined_call_operand.vmem [shape: f32[32,32], index: 1, kind: output, shape index: {}]  }
   0x1   :  { %v2_v0 = vld [vmem:[%s72_s0] sm:$0xff]  ;;  %v32_v1 = vld [vmem:[%s72_s0 + $0x8] sm:$0xff]  ;;  %v34_v2 = vld [vmem:[%s72_s0 + $0x10] sm:$0xff] }
   0x2   :  { %v5_v3 = vxor.u32 2147483648, %v2_v0  ;;  %v12_v4 = vxor.u32 2147483648, %v32_v1  ;;  %v20_v5 = vxor.u32 2147483648, %v34_v2  ;;  %v36_v6 = vld [vmem:[%s72_s0 + $0x18] sm:$0xff] }
   0x3   :  { %v28_v7 = vxor.u32 2147483648, %v36_v6 }
   0x4   :  { %7 = vst [vmem:[%s73_s1] sm:$0xff] %v5_v3  ;;  %33 = vst [vmem:[%s73_s1 + $0x8] sm:$0xff] %v12_v4 }
   0x5   :  { %35 = vst [vmem:[%s73_s1 + $0x10] sm:$0xff] %v20_v5  ;;  %37 = vst [vmem:[%s73_s1 + $0x18] sm:$0xff] %v28_v7 }

// kernel: custom-call.6
= control target key start
LH: loop header
LB: loop body
LE: loop exit
PB: predicated region body
PF: predicated region fallthrough
CT: control target
= control target key end

     0   :  { %s126_s0 = inlined_call_operand.vmem [shape: f32[2,8,32], index: 0, kind: input, shape index: {}]   ;;  %s127_s1 = inlined_call_operand.vmem [shape: f32[2,8,32], index: 1, kind: input, shape index: {}]   ;;  %s128_s2 = inlined_call_operand.hbm [shape: c64[2,8,32], index: 2, kind: output, shape index: {}]  }
   0x1   :  { %s87_s11 = scalar_lea.hbm %s128_s2, 256 }
   0x2   :  { %4 = vsyncpa [#allocation0], 0  ;;  %s5_s14 = sshll.u32 %s126_s0, 4  ;;  %s6_s14 = int_to_ptr.vmem [resolvable:$true] %s5_s14 }
   0x3   :  { %s18_s15 = scalar_lea.vmem %s6_s14, 256  ;;  %p23_p1 = scmp.lt.s32.totalorder %s6_s14, %s6_s14 }
   0x4   :  { %p19_p0 = scmp.ne.s32.totalorder %s6_s14, %s18_s15  ;;  %p24_p2 = scmp.lt.s32.totalorder %s18_s15, %s18_s15 }
   0x6   :  { %p25_p3 = por %p24_p2, %p23_p1 }
   0x8   :  { %p26_p4 = pnand %p25_p3, %p19_p0 }
   0xa   :  { %29 = shalt.err (!%p26_p4)  }
   0xb   :  { %p31_p5 = scmp.ne.s32.totalorder %s128_s2, %s87_s11  ;;  %s32_s0 = scalar_lea.hbm %s128_s2, 512 }
   0xc   :  { %p33_p6 = scmp.lt.u32.totalorder %s32_s0, %s87_s11  ;;  %p34_p7 = scmp.lt.u32.totalorder %s87_s11, %s128_s2 }
   0xe   :  { %p35_p8 = por %p34_p7, %p33_p6 }
  0x10   :  { %p36_p9 = pnand %p35_p8, %p31_p5 }
  0x12   :  { %39 = shalt.err (!%p36_p9)  }
  0x13   :  { %8 = dma.vmem_to_hbm [thread:$0]  %s6_s14, 256, %s128_s2, [#allocation0] }
  0x14   :  { %65 = dma.done.wait [#allocation0], 256  }
  0x15   :  { %66 = vsyncadd [#allocation0], 4294967040 }
  0x16   :  { %10 = vsyncpa [#allocation0], 1 }
  0x17   :  { %11 = vsyncpa [#allocation1], 0  ;;  %s12_s28 = sshll.u32 %s127_s1, 4  ;;  %s13_s28 = int_to_ptr.vmem [resolvable:$true] %s12_s28 }
  0x18   :  { %s40_s29 = scalar_lea.vmem %s13_s28, 256  ;;  %p45_p11 = scmp.lt.s32.totalorder %s13_s28, %s13_s28 }
  0x19   :  { %p41_p10 = scmp.ne.s32.totalorder %s13_s28, %s40_s29  ;;  %p46_p12 = scmp.lt.s32.totalorder %s40_s29, %s40_s29 }
  0x1b   :  { %p47_p13 = por %p46_p12, %p45_p11 }
  0x1d   :  { %p48_p0 = pnand %p47_p13, %p41_p10 }
  0x1f   :  { %51 = shalt.err (!%p48_p0)  }
  0x20   :  { %p53_p1 = scmp.ne.s32.totalorder %s87_s11, %s32_s0  ;;  %p56_p2 = scmp.lt.u32.totalorder %s32_s0, %s32_s0 }
  0x22   :  { %p57_p3 = por %p56_p2, %p34_p7 }
  0x24   :  { %p59_p4 = por %p57_p3, %p33_p6 }
  0x26   :  { %p60_p5 = pnand %p59_p4, %p53_p1 }
  0x28   :  { %63 = shalt.err (!%p60_p5)  }
  0x29   :  { %15 = dma.vmem_to_hbm [thread:$0]  %s13_s28, 256, %s87_s11, [#allocation1] }
  0x2a   :  { %67 = dma.done.wait [#allocation1], 256  }
  0x2b   :  { %68 = vsyncadd [#allocation1], 4294967040 }
  0x2c   :  { %17 = vsyncpa [#allocation1], 1 }

// kernel: custom-call.7
= control target key start
LH: loop header
LB: loop body
LE: loop exit
PB: predicated region body
PF: predicated region fallthrough
CT: control target
= control target key end

     0   :  { %s126_s0 = inlined_call_operand.vmem [shape: f32[2,8,7], index: 0, kind: input, shape index: {}]   ;;  %s127_s1 = inlined_call_operand.vmem [shape: f32[2,8,7], index: 1, kind: input, shape index: {}]   ;;  %s128_s2 = inlined_call_operand.hbm [shape: c64[2,8,7], index: 2, kind: output, shape index: {}]  }
   0x1   :  { %s87_s11 = scalar_lea.hbm %s128_s2, 224 }
   0x2   :  { %4 = vsyncpa [#allocation0], 0  ;;  %s5_s14 = sshll.u32 %s126_s0, 4  ;;  %s6_s14 = int_to_ptr.vmem [resolvable:$true] %s5_s14 }
   0x3   :  { %s18_s15 = scalar_lea.vmem %s6_s14, 224  ;;  %p23_p1 = scmp.lt.s32.totalorder %s6_s14, %s6_s14 }
   0x4   :  { %p19_p0 = scmp.ne.s32.totalorder %s6_s14, %s18_s15  ;;  %p24_p2 = scmp.lt.s32.totalorder %s18_s15, %s18_s15 }
   0x6   :  { %p25_p3 = por %p24_p2, %p23_p1 }
   0x8   :  { %p26_p4 = pnand %p25_p3, %p19_p0 }
   0xa   :  { %29 = shalt.err (!%p26_p4)  }
   0xb   :  { %p31_p5 = scmp.ne.s32.totalorder %s128_s2, %s87_s11  ;;  %s32_s0 = scalar_lea.hbm %s128_s2, 448 }
   0xc   :  { %p33_p6 = scmp.lt.u32.totalorder %s32_s0, %s87_s11  ;;  %p34_p7 = scmp.lt.u32.totalorder %s87_s11, %s128_s2 }
   0xe   :  { %p35_p8 = por %p34_p7, %p33_p6 }
  0x10   :  { %p36_p9 = pnand %p35_p8, %p31_p5 }
  0x12   :  { %39 = shalt.err (!%p36_p9)  }
  0x13   :  { %8 = dma.vmem_to_hbm [thread:$0]  %s6_s14, 224, %s128_s2, [#allocation0] }
  0x14   :  { %65 = dma.done.wait [#allocation0], 224  }
  0x15   :  { %66 = vsyncadd [#allocation0], 4294967072 }
  0x16   :  { %10 = vsyncpa [#allocation0], 1 }
  0x17   :  { %11 = vsyncpa [#allocation1], 0  ;;  %s12_s28 = sshll.u32 %s127_s1, 4  ;;  %s13_s28 = int_to_ptr.vmem [resolvable:$true] %s12_s28 }
  0x18   :  { %s40_s29 = scalar_lea.vmem %s13_s28, 224  ;;  %p45_p11 = scmp.lt.s32.totalorder %s13_s28, %s13_s28 }
  0x19   :  { %p41_p10 = scmp.ne.s32.totalorder %s13_s28, %s40_s29  ;;  %p46_p12 = scmp.lt.s32.totalorder %s40_s29, %s40_s29 }
  0x1b   :  { %p47_p13 = por %p46_p12, %p45_p11 }
  0x1d   :  { %p48_p0 = pnand %p47_p13, %p41_p10 }
  0x1f   :  { %51 = shalt.err (!%p48_p0)  }
  0x20   :  { %p53_p1 = scmp.ne.s32.totalorder %s87_s11, %s32_s0  ;;  %p56_p2 = scmp.lt.u32.totalorder %s32_s0, %s32_s0 }
  0x22   :  { %p57_p3 = por %p56_p2, %p34_p7 }
  0x24   :  { %p59_p4 = por %p57_p3, %p33_p6 }
  0x26   :  { %p60_p5 = pnand %p59_p4, %p53_p1 }
  0x28   :  { %63 = shalt.err (!%p60_p5)  }
  0x29   :  { %15 = dma.vmem_to_hbm [thread:$0]  %s13_s28, 224, %s87_s11, [#allocation1] }
  0x2a   :  { %67 = dma.done.wait [#allocation1], 224  }
  0x2b   :  { %68 = vsyncadd [#allocation1], 4294967072 }
  0x2c   :  { %17 = vsyncpa [#allocation1], 1 }

// kernel: multihead_attention_fu.3
= control target key start
LH: loop header
LB: loop body
LE: loop exit
PB: predicated region body
PF: predicated region fallthrough
CT: control target
= control target key end

     0   :  { %8 = vsyncpa [#allocation3], 0  ;;  %s441_s0 = inlined_call_operand.hbm [shape: f32[32,32], index: 0, kind: input, shape index: {}]   ;;  %s442_s1 = inlined_call_operand.hbm [shape: f32[32,32], index: 1, kind: input, shape index: {}]   ;;  %s443_s2 = inlined_call_operand.hbm [shape: f32[1,32], index: 2, kind: input, shape index: {}]   ;;  %s444_s3 = inlined_call_operand.hbm [shape: f32[16,128], index: 3, kind: output, shape index: {}]  }
   0x1   :  { %9 = vsyncpa [#allocation6], 0 }
   0x2   :  { %10 = vsyncpa [#allocation4], 0  ;;  %s344_s12 = smov [#allocation5]   ;;  %s345_s14 = smov [#allocation2]  }
   0x3   :  { %s28_s13 = sshll.u32 %s344_s12, 4  ;;  %s16_s15 = sshll.u32 %s345_s14, 4  ;;  %s29_s13 = int_to_ptr.vmem [resolvable:$true] %s28_s13  ;;  %s371_s15 = int_to_ptr.vmem [resolvable:$true] %s16_s15 }
   0x4   :  { %s250_s18 = scalar_lea.hbm %s442_s1, 512 }
   0x5   :  { %p251_p0 = scmp.ne.s32.totalorder %s442_s1, %s250_s18  ;;  %p254_p1 = scmp.lt.u32.totalorder %s250_s18, %s442_s1 }
   0x7   :  { %p256_p2 = pnand %p254_p1, %p251_p0 }
   0x9   :  { %259 = shalt.err (!%p256_p2)
}
   0xa   :  { %s260_s23 = scalar_lea.vmem %s29_s13, 512  ;;  %p265_p4 = scmp.lt.s32.totalorder %s29_s13, %s29_s13 }
   0xb   :  { %p261_p3 = scmp.ne.s32.totalorder %s29_s13, %s260_s23  ;;  %p266_p5 = scmp.lt.s32.totalorder %s260_s23, %s260_s23 }
   0xd   :  { %p267_p6 = por %p266_p5, %p265_p4 }
   0xf   :  { %p268_p7 = pnand %p267_p6, %p261_p3 }
  0x11   :  { %271 = shalt.err (!%p268_p7)
}
  0x12   :  { %s346_s24 = smov 128   ;;  %s347_s25 = smov 8  }
  0x13   :  { %34 = dma.hbm_to_vmem [thread:$0]  %s442_s1, 512, %s29_s13, [#allocation6], %s346_s24, %s346_s24, %s347_s25  }
  0x14   :  { %s272_s30 = scalar_lea.hbm %s441_s0, 512 }
  0x15   :  { %p273_p8 = scmp.ne.s32.totalorder %s441_s0, %s272_s30  ;;  %p276_p9 = scmp.lt.u32.totalorder %s272_s30, %s441_s0 }
  0x17   :  { %p278_p10 = pnand %p276_p9, %p273_p8 }
  0x19   :  { %281 = shalt.err (!%p278_p10)
}
  0x1a   :  { %s282_s8 = scalar_lea.vmem %s371_s15, 512  ;;  %p287_p12 = scmp.lt.s32.totalorder %s371_s15, %s371_s15 }
  0x1b   :  { %p283_p11 = scmp.ne.s32.totalorder %s371_s15, %s282_s8  ;;  %p288_p13 = scmp.lt.s32.totalorder %s282_s8, %s282_s8 }
  0x1d   :  { %p289_p0 = por %p288_p13, %p287_p12 }
  0x1f   :  { %p290_p1 = pnand %p289_p0, %p283_p11 }
  0x21   :  { %293 = shalt.err (!%p290_p1)
}
  0x22   :  { %22 = dma.hbm_to_vmem [thread:$0]  %s441_s0, 512, %s371_s15, [#allocation3], %s346_s24, %s346_s24, %s347_s25  }
  0x23   :  { %s348_s10 = smov [#allocation7]   ;;  %s294_s14 = scalar_lea.hbm %s443_s2, 16 }
  0x24   :  { %s41_s11 = sshll.u32 %s348_s10, 4  ;;  %p295_p2 = scmp.ne.s32.totalorder %s443_s2, %s294_s14  ;;  %s42_s11 = int_to_ptr.vmem [resolvable:$true] %s41_s11 }
  0x25   :  { %p298_p3 = scmp.lt.u32.totalorder %s294_s14, %s443_s2 }
  0x27   :  { %p300_p4 = pnand %p298_p3, %p295_p2 }
  0x29   :  { %303 = shalt.err (!%p300_p4)
}
  0x2a   :  { %s304_s20 = scalar_lea.vmem %s42_s11, 16  ;;  %s308_s0 = scalar_lea.vmem %s42_s11, 32 }
  0x2b   :  { %p305_p5 = scmp.ne.s32.totalorder %s42_s11, %s304_s20  ;;  %p309_p6 = scmp.lt.s32.totalorder %s42_s11, %s42_s11 }
  0x2c   :  { %p310_p7 = scmp.lt.s32.totalorder %s308_s0, %s304_s20 }
  0x2e   :  { %p311_p8 = por %p310_p7, %p309_p6 }
  0x30   :  { %p312_p9 = pnand %p311_p8, %p305_p5 }
  0x32   :  { %315 = shalt.err (!%p312_p9)
}
  0x33   :  { %44 = dma.hbm_to_vmem [thread:$0]  %s443_s2, 16, %s42_s11, [#allocation6]  }
  0x34   :  { %338 = dma.done.wait [#allocation3], 512  }
  0x35   :  { %339 = vsyncadd [#allocation3], 4294966784 }
  0x36   :  { %340 = dma.done.wait [#allocation6], 528  }
  0x37   :  { %341 = vsyncadd [#allocation6], 4294966768  ;;  %vm69_vm0 = vcmask 261120   ;;  %v58_v0 = vld [vmem:[#allocation5] sm:$0xff]  ;;  %v59_v1 = vld [vmem:[#allocation5 + $0x8] sm:$0xff]  ;;  %s349_s2 = smov 32  }
  0x38   :  { %v60_v2 = vld [vmem:[#allocation5 + $0x10] sm:$0xff]  ;;  %v231_v3 = vpack.c.bf16 %v59_v1, %v58_v0  ;;  %v61_v4 = vld [vmem:[#allocation5 + $0x18] sm:$0xff]  ;;  %v54_v5 = vld [vmem:[#allocation2] sm:$0xff]  ;;  %vm181_vm1 = vcmask 523264   ;;  %s350_s22 = smov [#allocation8]  }
  0x39   :  { %v56_v6 = vld [vmem:[#allocation2 + $0x10] sm:$0xff]  ;;  %v235_v7 = vpack.c.bf16 %v61_v4, %v60_v2  ;;  %225 = vmatprep.mubr.msk.f32.mxu0 %vm69_vm0, %v54_v5  ;;  %v55_v8 = vld [vmem:[#allocation2 + $0x8] sm:$0xff]  ;;  %v57_v9 = vld [vmem:[#allocation2 + $0x18] sm:$0xff]  ;;  %s191_s23 = sshll.u32 %s350_s22, 4  ;;  %s192_s23 = int_to_ptr.vmem [resolvable:$true] %s191_s23 }
  0x3a   :  { %228 = vmatprep.mubr.msk.f32.mxu1 %vm69_vm0, %v56_v6  ;;  %232 = vmatprep.subr.bf16.mxu0 %v231_v3  ;;  %v204_v10 = vld [vmem:[#allocation7] ss:$0 sm:$0xff]  ;;  %s316_s26 = scalar_lea.vmem %s192_s23, 256  ;;  %p321_p11 = scmp.lt.s32.totalorder %s192_s23, %s192_s23 }
  0x3b   :  { %239 = vmatprep.subr.bf16.mxu1 %v231_v3  ;;  %234 = vmatpush3.bf16.msra.mxu0 %v231_v3  ;;  %p317_p10 = scmp.ne.s32.totalorder %s192_s23, %s316_s26  ;;  %p322_p12 = scmp.lt.s32.totalorder %s316_s26, %s316_s26 }
  0x3c   :  { %241 = vmatpush3.bf16.msra.mxu1 %v231_v3  ;;  %236 = vmatprep.subr.bf16.mxu0 %v235_v7 }
  0x3d   :  { %240 = vmatprep.subr.bf16.mxu1 %v235_v7  ;;  %p323_p13 = por %p322_p12, %p321_p11 }
  0x3f   :  { %238 = vmatpush3.bf16.msra.mxu0 %v235_v7  ;;  %p324_p0 = pnand %p323_p13, %p317_p10 }
  0x40   :  { %242 = vmatpush3.bf16.msra.mxu1 %v235_v7 }
  0x42   :  { %226 = vmatmul.mubr.msk.f32.vlgmr.msra.gmra.mrb[0].mxu0 %vm69_vm0, %v55_v8 }
  0x43   :  { %229 = vmatmul.mubr.msk.f32.vlgmr.msra.gmra.mrb[0].mxu1 %vm69_vm0, %v57_v9 }
 0x115   :  { %v227_v11 = vpop.f32.mrb[0].mxu0 }
 0x116   :  { %v230_v12 = vpop.f32.mrb[0].mxu1  ;;  %v154_v13 = vadd.f32 %v227_v11, %v204_v10  ;;  %v148_v15 = vpop.f32.mrb[1].mxu0 }
 0x117   :  { %v164_v14 = vadd.f32 %v230_v12, %v204_v10  ;;  %v158_v16 = vpop.f32.mrb[1].mxu1  ;;  %v149_v17 = vadd.f32 %v204_v10, %v148_v15 }
 0x118   :  { %v159_v18 = vadd.f32 %v204_v10, %v158_v16 }
 0x119   :  { %v168_v19 = vsub.f32 %v154_v13, %v164_v14  ;;  %v170_v20 = vadd.f32 %v164_v14, %v154_v13 }
 0x11a   :  { %v167_v21 = vsub.f32 %v149_v17, %v159_v18  ;;  %v169_v22 = vadd.f32 %v159_v18, %v149_v17 }
 0x11c   :  { %173 = vrot.lane.b32.xlu0 %v169_v22, %s349_s2 }
 0x120   :  { %175 = vrot.lane.b32.xlu0 %v170_v20, %s349_s2 }
 0x18e   :  { %v174_v23 = vpop.permute.xlu0 %173 }
 0x18f   :  { %v179_v24 = vsel %vm69_vm0, %v167_v21, %v174_v23 }
 0x190   :  { %v182_v25 = vsel %vm181_vm1, %v179_v24, 0.0 }
 0x191   :  { %184 = vst [vmem:[#allocation8] sm:$0xff] %v182_v25 }
 0x192   :  { %v176_v26 = vpop.permute.xlu0 %175 }
 0x193   :  { %v180_v27 = vsel %vm69_vm0, %v168_v19, %v176_v26 }
 0x194   :  { %v183_v28 = vsel %vm181_vm1, %v180_v27, 0.0 }
 0x195   :  { %185 = vst [vmem:[#allocation8 + $0x8] sm:$0xff] %v183_v28 }
 0x196   :  { %327 = shalt.err (!%p324_p0)
}
 0x197   :  { %s328_s29 = scalar_lea.hbm %s444_s3, 256 }
 0x198   :  { %p329_p1 = scmp.ne.s32.totalorder %s444_s3, %s328_s29  ;;  %p332_p2 = scmp.lt.u32.totalorder %s328_s29, %s444_s3 }
 0x19a   :  { %p334_p3 = pnand %p332_p2, %p329_p1 }
 0x19c   :  { %337 = shalt.err (!%p334_p3)
}
 0x19d   :  { %197 = dma.vmem_to_hbm [thread:$0]  %s192_s23, 256, %s444_s3, [#allocation4], %s346_s24, %s346_s24, %s347_s25  }
 0x19e   :  { %342 = dma.done.wait [#allocation4], 256  }
 0x19f   :  { %343 = vsyncadd [#allocation4], 4294967040 }
 0x1a0   :  { %201 = vsyncpa [#allocation3], 1 }
 0x1a1   :  { %202 = vsyncpa [#allocation6], 1 }
 0x1a2   :  { %203 = vsyncpa [#allocation4], 1 }

// kernel: multihead_attention_fu.2
= control target key start
LH: loop header
LB: loop body
LE: loop exit
PB: predicated region body
PF: predicated region fallthrough
CT: control target
= control target key end

     0   :  { %14 = vsyncpa [#allocation3], 0  ;;  %s1970_s0 = inlined_call_operand.hbm [shape: f32[16,64], index: 0, kind: input, shape index: {}]   ;;  %s1971_s1 = inlined_call_operand.hbm [shape: f32[16,64], index: 1, kind: input, shape index: {}]   ;;  %s1972_s2 = inlined_call_operand.hbm [shape: f32[16,64], index: 2, kind: input, shape index: {}]   ;;  %s1973_s3 = inlined_call_operand.hbm [shape: f32[64,64], index: 3, kind: input, shape index: {}]   ;;  %s1974_s4 = inlined_call_operand.hbm [shape: f32[64,64], index: 4, kind: input, shape index: {}]   ;;  %s1975_s5 = inlined_call_operand.hbm [shape: f32[64,64], index: 5, kind: input, shape index: {}]   ;;  %s1976_s6 = inlined_call_operand.hbm [shape: f32[1,64], index: 6, kind: input, shape index: {}]   ;;  %s1977_s7 = inlined_call_operand.hbm [shape: f32[1,64], index: 7, kind: input, shape index: {}]   ;;  %s1978_s8 = inlined_call_operand.hbm [shape: f32[1,64], index: 8, kind: input, shape index: {}]   ;;  %s1979_s9 = inlined_call_operand.hbm [shape: f32[16,128], index: 9, kind: output, shape index: {}]  }
   0x1   :  { %15 = vsyncpa [#allocation6], 0 }
   0x2   :  { %16 = vsyncpa [#allocation9], 0 }
   0x3   :  { %17 = vsyncpa [#allocation12], 0 }
   0x4   :  { %18 = vsyncpa [#allocation15], 0 }
   0x5   :  { %19 = vsyncpa [#allocation4], 0  ;;  %s1559_s30 = smov [#allocation5]   ;;  %s1560_s11 = smov [#allocation8]  }
   0x6   :  { %s37_s10 = sshll.u32 %s1559_s30, 4  ;;  %s61_s12 = sshll.u32 %s1560_s11, 4  ;;  %s38_s10 = int_to_ptr.vmem [resolvable:$true] %s37_s10  ;;  %s1628_s12 = int_to_ptr.vmem [resolvable:$true] %s61_s12 }
   0x7   :  { %s1327_s15 = scalar_lea.hbm %s1971_s1, 256 }
   0x8   :  { %p1328_p0 = scmp.ne.s32.totalorder %s1971_s1, %s1327_s15  ;;  %p1331_p1 = scmp.lt.u32.totalorder %s1327_s15, %s1971_s1 }
   0xa   :  { %p1333_p2 = pnand %p1331_p1, %p1328_p0 }
   0xc   :  { %1336 = shalt.err (!%p1333_p2)
}
   0xd   :  { %s1337_s20 = scalar_lea.vmem %s38_s10, 256  ;;  %p1342_p4 = scmp.lt.s32.totalorder %s38_s10, %s38_s10 }
   0xe   :  { %p1338_p3 = scmp.ne.s32.totalorder %s38_s10, %s1337_s20  ;;  %p1343_p5 = scmp.lt.s32.totalorder %s1337_s20, %s1337_s20 }
  0x10   :  { %p1344_p6 = por %p1343_p5, %p1342_p4 }
  0x12   :  { %p1345_p7 = pnand %p1344_p6, %p1338_p3 }
  0x14   :  { %1348 = shalt.err (!%p1345_p7)
}
  0x15   :  { %s1561_s21 = smov 128   ;;  %s1562_s22 = smov 8  }
  0x16   :  { %43 = dma.hbm_to_vmem [thread:$0]  %s1971_s1, 256, %s38_s10, [#allocation6], %s1561_s21, %s1561_s21, %s1562_s22  }
  0x17   :  { %s1349_s27 = scalar_lea.hbm %s1973_s3, 1024 }
  0x18   :  { %p1350_p8 = scmp.ne.s32.totalorder %s1973_s3, %s1349_s27  ;;  %p1353_p9 = scmp.lt.u32.totalorder %s1349_s27, %s1973_s3 }
  0x1a   :  { %p1355_p10 = pnand %p1353_p9, %p1350_p8 }
  0x1c   :  { %1358 = shalt.err (!%p1355_p10)
}
  0x1d   :  { %s1359_s13 = scalar_lea.vmem %s1628_s12, 1024  ;;  %p1364_p12 = scmp.lt.s32.totalorder %s1628_s12, %s1628_s12 }
  0x1e   :  { %p1360_p11 = scmp.ne.s32.totalorder %s1628_s12, %s1359_s13  ;;  %p1365_p13 = scmp.lt.s32.totalorder %s1359_s13, %s1359_s13 }
  0x20   :  { %p1366_p0 = por %p1365_p13, %p1364_p12 }
  0x22   :  { %p1367_p1 = pnand %p1366_p0, %p1360_p11 }
  0x24   :  { %1370 = shalt.err (!%p1367_p1)
}
  0x25   :  { %67 = dma.hbm_to_vmem [thread:$0]  %s1973_s3, 1024, %s1628_s12, [#allocation9], %s1561_s21, %s1561_s21, %s1562_s22  }
  0x26   :  { %s1563_s14 = smov [#allocation11]   ;;  %s1564_s16 = smov [#allocation14]  }
  0x27   :  { %s85_s15 = sshll.u32 %s1563_s14, 4  ;;  %s108_s17 = sshll.u32 %s1564_s16, 4  ;;  %s86_s15 = int_to_ptr.vmem [resolvable:$true] %s85_s15  ;;  %s109_s17 = int_to_ptr.vmem [resolvable:$true] %s108_s17 }
  0x28   :  { %s1371_s20 = scalar_lea.hbm %s1975_s5, 1024 }
  0x29   :  { %p1372_p2 = scmp.ne.s32.totalorder %s1975_s5, %s1371_s20  ;;  %p1375_p3 = scmp.lt.u32.totalorder %s1371_s20, %s1975_s5 }
  0x2b   :  { %p1377_p4 = pnand %p1375_p3, %p1372_p2 }
  0x2d   :  { %1380 = shalt.err (!%p1377_p4)
}
  0x2e   :  { %s1381_s3 = scalar_lea.vmem %s86_s15, 1024  ;;  %p1386_p6 = scmp.lt.s32.totalorder %s86_s15, %s86_s15 }
  0x2f   :  { %p1382_p5 = scmp.ne.s32.totalorder %s86_s15, %s1381_s3  ;;  %p1387_p7 = scmp.lt.s32.totalorder %s1381_s3, %s1381_s3 }
  0x31   :  { %p1388_p8 = por %p1387_p7, %p1386_p6 }
  0x33   :  { %p1389_p9 = pnand %p1388_p8, %p1382_p5 }
  0x35   :  { %1392 = shalt.err (!%p1389_p9)
}
  0x36   :  { %91 = dma.hbm_to_vmem [thread:$0]  %s1975_s5, 1024, %s86_s15, [#allocation12], %s1561_s21, %s1561_s21, %s1562_s22  }
  0x37   :  { %s1393_s30 = scalar_lea.hbm %s1977_s7, 16 }
  0x38   :  { %p1394_p10 = scmp.ne.s32.totalorder %s1977_s7, %s1393_s30  ;;  %p1397_p11 = scmp.lt.u32.totalorder %s1393_s30, %s1977_s7 }
  0x3a   :  { %p1399_p12 = pnand %p1397_p11, %p1394_p10 }
  0x3c   :  { %1402 = shalt.err (!%p1399_p12)
}
  0x3d   :  { %s1403_s14 = scalar_lea.vmem %s109_s17, 16  ;;  %s1407_s16 = scalar_lea.vmem %s109_s17, 32 }
  0x3e   :  { %p1404_p13 = scmp.ne.s32.totalorder %s109_s17, %s1403_s14  ;;  %p1408_p0 = scmp.lt.s32.totalorder %s109_s17, %s109_s17 }
  0x3f   :  { %p1409_p1 = scmp.lt.s32.totalorder %s1407_s16, %s1403_s14 }
  0x41   :  { %p1410_p2 = por %p1409_p1, %p1408_p0 }
  0x43   :  { %p1411_p3 = pnand %p1410_p2, %p1404_p13 }
  0x45   :  { %1414 = shalt.err (!%p1411_p3)
}
  0x46   :  { %111 = dma.hbm_to_vmem [thread:$0]  %s1977_s7, 16, %s109_s17, [#allocation15]  }
  0x47   :  { %s1565_s18 = smov [#allocation2]   ;;  %s1566_s20 = smov [#allocation7]  }
  0x48   :  { %s25_s19 = sshll.u32 %s1565_s18, 4  ;;  %s49_s23 = sshll.u32 %s1566_s20, 4  ;;  %s26_s19 = int_to_ptr.vmem [resolvable:$true] %s25_s19  ;;  %s1692_s23 = int_to_ptr.vmem [resolvable:$true] %s49_s23 }
  0x49   :  { %s1415_s26 = scalar_lea.hbm %s1970_s0, 256 }
  0x4a   :  { %p1416_p4 = scmp.ne.s32.totalorder %s1970_s0, %s1415_s26  ;;  %p1419_p5 = scmp.lt.u32.totalorder %s1415_s26, %s1970_s0 }
  0x4c   :  { %p1421_p6 = pnand %p1419_p5, %p1416_p4 }
  0x4e   :  { %1424 = shalt.err (!%p1421_p6)
}
  0x4f   :  { %s1425_s7 = scalar_lea.vmem %s26_s19, 256  ;;  %p1430_p8 = scmp.lt.s32.totalorder %s26_s19, %s26_s19 }
  0x50   :  { %p1426_p7 = scmp.ne.s32.totalorder %s26_s19, %s1425_s7  ;;  %p1431_p9 = scmp.lt.s32.totalorder %s1425_s7, %s1425_s7 }
  0x52   :  { %p1432_p10 = por %p1431_p9, %p1430_p8 }
  0x54   :  { %p1433_p11 = pnand %p1432_p10, %p1426_p7 }
  0x56   :  { %1436 = shalt.err (!%p1433_p11)
}
  0x57   :  { %31 = dma.hbm_to_vmem [thread:$0]  %s1970_s0, 256, %s26_s19, [#allocation3], %s1561_s21, %s1561_s21, %s1562_s22  }
  0x58   :  { %s1437_s13 = scalar_lea.hbm %s1972_s2, 256 }
  0x59   :  { %p1438_p12 = scmp.ne.s32.totalorder %s1972_s2, %s1437_s13  ;;  %p1441_p13 = scmp.lt.u32.totalorder %s1437_s13, %s1972_s2 }
  0x5b   :  { %p1443_p0 = pnand %p1441_p13, %p1438_p12 }
  0x5d   :  { %1446 = shalt.err (!%p1443_p0)
}
  0x5e   :  { %s1447_s5 = scalar_lea.vmem %s1692_s23, 256  ;;  %p1452_p2 = scmp.lt.s32.totalorder %s1692_s23, %s1692_s23 }
  0x5f   :  { %p1448_p1 = scmp.ne.s32.totalorder %s1692_s23, %s1447_s5  ;;  %p1453_p3 = scmp.lt.s32.totalorder %s1447_s5, %s1447_s5 }
  0x61   :  { %p1454_p4 = por %p1453_p3, %p1452_p2 }
  0x63   :  { %p1455_p5 = pnand %p1454_p4, %p1448_p1 }
  0x65   :  { %1458 = shalt.err (!%p1455_p5)
}
  0x66   :  { %55 = dma.hbm_to_vmem [thread:$0]  %s1972_s2, 256, %s1692_s23, [#allocation6], %s1561_s21, %s1561_s21, %s1562_s22  }
  0x67   :  { %s1567_s18 = smov [#allocation10]   ;;  %s1568_s20 = smov [#allocation13]  }
  0x68   :  { %s73_s19 = sshll.u32 %s1567_s18, 4  ;;  %s98_s24 = sshll.u32 %s1568_s20, 4  ;;  %s74_s19 = int_to_ptr.vmem [resolvable:$true] %s73_s19  ;;  %s99_s24 = int_to_ptr.vmem [resolvable:$true] %s98_s24 }
  0x69   :  { %s1459_s3 = scalar_lea.hbm %s1974_s4, 1024 }
  0x6a   :  { %p1460_p6 = scmp.ne.s32.totalorder %s1974_s4, %s1459_s3  ;;  %p1463_p7 = scmp.lt.u32.totalorder %s1459_s3, %s1974_s4 }
  0x6c   :  { %p1465_p8 = pnand %p1463_p7, %p1460_p6 }
  0x6e   :  { %1468 = shalt.err (!%p1465_p8)
}
  0x6f   :  { %s1469_s2 = scalar_lea.vmem %s74_s19, 1024  ;;  %p1474_p10 = scmp.lt.s32.totalorder %s74_s19, %s74_s19 }
  0x70   :  { %p1470_p9 = scmp.ne.s32.totalorder %s74_s19, %s1469_s2  ;;  %p1475_p11 = scmp.lt.s32.totalorder %s1469_s2, %s1469_s2 }
  0x72   :  { %p1476_p12 = por %p1475_p11, %p1474_p10 }
  0x74   :  { %p1477_p13 = pnand %p1476_p12, %p1470_p9 }
  0x76   :  { %1480 = shalt.err (!%p1477_p13)
}
  0x77   :  { %79 = dma.hbm_to_vmem [thread:$0]  %s1974_s4, 1024, %s74_s19, [#allocation9], %s1561_s21, %s1561_s21, %s1562_s22  }
  0x78   :  { %s1481_s11 = scalar_lea.hbm %s1976_s6, 16 }
  0x79   :  { %p1482_p0 = scmp.ne.s32.totalorder %s1976_s6, %s1481_s11  ;;  %p1485_p1 = scmp.lt.u32.totalorder %s1481_s11, %s1976_s6 }
  0x7b   :  { %p1487_p2 = pnand %p1485_p1, %p1482_p0 }
  0x7d   :  { %1490 = shalt.err (!%p1487_p2)
}
  0x7e   :  { %s1491_s16 = scalar_lea.vmem %s99_s24, 16  ;;  %s1495_s5 = scalar_lea.vmem %s99_s24, 32 }
  0x7f   :  { %p1492_p3 = scmp.ne.s32.totalorder %s99_s24, %s1491_s16  ;;  %p1496_p4 = scmp.lt.s32.totalorder %s99_s24, %s99_s24 }
  0x80   :  { %p1497_p5 = scmp.lt.s32.totalorder %s1495_s5, %s1491_s16 }
  0x82   :  { %p1498_p6 = por %p1497_p5, %p1496_p4 }
  0x84   :  { %p1499_p7 = pnand %p1498_p6, %p1492_p3 }
  0x86   :  { %1502 = shalt.err (!%p1499_p7)
}
  0x87   :  { %101 = dma.hbm_to_vmem [thread:$0]  %s1976_s6, 16, %s99_s24, [#allocation12]  }
  0x88   :  { %s1569_s15 = smov [#allocation16]   ;;  %s1503_s25 = scalar_lea.hbm %s1978_s8, 16 }
  0x89   :  { %s118_s18 = sshll.u32 %s1569_s15, 4  ;;  %p1504_p8 = scmp.ne.s32.totalorder %s1978_s8, %s1503_s25  ;;  %s119_s18 = int_to_ptr.vmem [resolvable:$true] %s118_s18 }
  0x8a   :  { %p1507_p9 = scmp.lt.u32.totalorder %s1503_s25, %s1978_s8 }
  0x8c   :  { %p1509_p10 = pnand %p1507_p9, %p1504_p8 }
  0x8e   :  { %1512 = shalt.err (!%p1509_p10)
}
  0x8f   :  { %s1513_s28 = scalar_lea.vmem %s119_s18, 16  ;;  %s1517_s6 = scalar_lea.vmem %s119_s18, 32 }
  0x90   :  { %p1514_p11 = scmp.ne.s32.totalorder %s119_s18, %s1513_s28  ;;  %p1518_p12 = scmp.lt.s32.totalorder %s119_s18, %s119_s18 }
  0x91   :  { %p1519_p13 = scmp.lt.s32.totalorder %s1517_s6, %s1513_s28 }
  0x93   :  { %p1520_p0 = por %p1519_p13, %p1518_p12 }
  0x95   :  { %p1521_p1 = pnand %p1520_p0, %p1514_p11 }
  0x97   :  { %1524 = shalt.err (!%p1521_p1)
}
  0x98   :  { %121 = dma.hbm_to_vmem [thread:$0]  %s1978_s8, 16, %s119_s18, [#allocation15]  }
  0x99   :  { %1547 = dma.done.wait [#allocation3], 256  }
  0x9a   :  { %1548 = vsyncadd [#allocation3], 4294967040 }
  0x9b   :  { %1549 = dma.done.wait [#allocation6], 512  }
  0x9c   :  { %1550 = vsyncadd [#allocation6], 4294966784 }
  0x9d   :  { %1551 = dma.done.wait [#allocation9], 2048  }
  0x9e   :  { %1552 = vsyncadd [#allocation9], 4294965248 }
  0x9f   :  { %1553 = dma.done.wait [#allocation12], 1040  }
  0xa0   :  { %1554 = vsyncadd [#allocation12], 4294966256 }
  0xa1   :  { %1555 = dma.done.wait [#allocation15], 32  }
  0xa2   :  { %1556 = vsyncadd [#allocation15], 4294967264  ;;  %v250_v0 = vld [vmem:[#allocation10] sm:$0xff]  ;;  %v251_v1 = vld [vmem:[#allocation10 + $0x8] sm:$0xff]  ;;  %vm166_vm0 = vcmask 523264   ;;  %s1570_s8 = smov 32  }
  0xa3   :  { %v252_v2 = vld [vmem:[#allocation10 + $0x10] sm:$0xff]  ;;  %v1232_v3 = vpack.c.bf16 %v251_v1, %v250_v0  ;;  %v253_v4 = vld [vmem:[#allocation10 + $0x18] sm:$0xff]  ;;  %v254_v6 = vld [vmem:[#allocation10 + $0x20] sm:$0xff]  ;;  %vm489_vm1 = vcmask 261120   ;;  %s1571_s2 = smov 96   ;;  %s1572_s23 = smov 120  }
  0xa4   :  { %v1236_v5 = vpack.c.bf16 %v253_v4, %v252_v2  ;;  %v255_v7 = vld [vmem:[#allocation10 + $0x28] sm:$0xff]  ;;  %v248_v8 = vld [vmem:[#allocation5] sm:$0xff]  ;;  %v153_v12 = vld [vmem:[#allocation8 + $0x10] sm:$0xff]  ;;  %v480_v4 = vlaneseq  ;;  %vm578_vm4 = vcmask 64512   ;;  %s1573_s17 = smov 64   ;;  %s1574_s29 = smov 72  }
  0xa5   :  { %1233 = vmatprep.subr.bf16.mxu1 %v1232_v3  ;;  %1170 = vmatprep.mubr.msk.f32.mxu1 %vm166_vm0, %v248_v8  ;;  %v151_v9 = vld [vmem:[#allocation8] sm:$0xff]  ;;  %v152_v10 = vld [vmem:[#allocation8 + $0x8] sm:$0xff]  ;;  %v154_v13 = vld [vmem:[#allocation8 + $0x18] sm:$0xff]  ;;  %v1240_v14 = vpack.c.bf16 %v255_v7, %v254_v6  ;;  %s1575_s30 = smov 80   ;;  %s1576_s11 = smov 88   ;;  %vm760_vm5 = vcmask 588800  }
  0xa6   :  { %1235 = vmatpush3.bf16.msra.mxu1 %v1232_v3  ;;  %v1216_v11 = vpack.c.bf16 %v152_v10, %v151_v9  ;;  %v1220_v15 = vpack.c.bf16 %v154_v13, %v153_v12  ;;  %v155_v16 = vld [vmem:[#allocation8 + $0x20] sm:$0xff]  ;;  %v156_v17 = vld [vmem:[#allocation8 + $0x28] sm:$0xff]  ;;  %v256_v18 = vld [vmem:[#allocation10 + $0x30] sm:$0xff]  ;;  %vm762_vm6 = vcmask 654336   ;;  %vm764_vm7 = vcmask 719872   ;;  %s1577_s13 = smov [#allocation17]  }
  0xa7   :  { %1237 = vmatprep.subr.bf16.mxu1 %v1236_v5  ;;  %v257_v19 = vld [vmem:[#allocation10 + $0x38] sm:$0xff]  ;;  %v149_v20 = vld [vmem:[#allocation2] sm:$0xff]  ;;  %v1224_v21 = vpack.c.bf16 %v156_v17, %v155_v16  ;;  %v249_v26 = vld [vmem:[#allocation5 + $0x8] sm:$0xff]  ;;  %s1054_s1 = sshll.u32 %s1577_s13, 4  ;;  %vm766_vm8 = vcmask 785408   ;;  %s1055_s1 = int_to_ptr.vmem [resolvable:$true] %s1054_s1 }
  0xa8   :  { %1217 = vmatprep.subr.bf16.mxu0 %v1216_v11  ;;  %1151 = vmatprep.mubr.msk.f32.mxu0 %vm166_vm0, %v149_v20  ;;  %v1244_v22 = vpack.c.bf16 %v257_v19, %v256_v18  ;;  %v157_v23 = vld [vmem:[#allocation8 + $0x30] sm:$0xff]  ;;  %v158_v24 = vld [vmem:[#allocation8 + $0x38] sm:$0xff]  ;;  %v1073_v28 = vld [vmem:[#allocation14] ss:$0 sm:$0xff]  ;;  %s1525_s10 = scalar_lea.vmem %s1055_s1, 256  ;;  %p1530_p3 = scmp.lt.s32.totalorder %s1055_s1, %s1055_s1 }
  0xa9   :  { %1219 = vmatpush3.bf16.msra.mxu0 %v1216_v11  ;;  %v1228_v25 = vpack.c.bf16 %v158_v24, %v157_v23  ;;  %v150_v27 = vld [vmem:[#allocation2 + $0x8] sm:$0xff]  ;;  %v1070_v32 = vld [vmem:[#allocation13] ss:$0 sm:$0xff]  ;;  %v349_v40 = vld [vmem:[#allocation11 + $0x8] sm:$0xff]  ;;  %p1526_p2 = scmp.ne.s32.totalorder %s1055_s1, %s1525_s10  ;;  %p1531_p4 = scmp.lt.s32.totalorder %s1525_s10, %s1525_s10 }
  0xaa   :  { %1239 = vmatpush3.bf16.msra.mxu1 %v1236_v5  ;;  %1221 = vmatprep.subr.bf16.mxu0 %v1220_v15  ;;  %v348_v39 = vld [vmem:[#allocation11] sm:$0xff]  ;;  %v350_v41 = vld [vmem:[#allocation11 + $0x10] sm:$0xff]  ;;  %v351_v44 = vld [vmem:[#allocation11 + $0x18] sm:$0xff]  ;;  %v1804_v5 = vand.u32 127, %v480_v4 }
  0xab   :  { %1241 = vmatprep.subr.bf16.mxu1 %v1240_v14  ;;  %v1248_v43 = vpack.c.bf16 %v349_v40, %v348_v39  ;;  %v1252_v45 = vpack.c.bf16 %v351_v44, %v350_v41  ;;  %v352_v46 = vld [vmem:[#allocation11 + $0x20] sm:$0xff]  ;;  %v353_v47 = vld [vmem:[#allocation11 + $0x28] sm:$0xff]  ;;  %v346_v48 = vld [vmem:[#allocation7] sm:$0xff]  ;;  %p1532_p5 = por %p1531_p4, %p1530_p3 }
  0xac   :  { %v1256_v49 = vpack.c.bf16 %v353_v47, %v352_v46  ;;  %v354_v50 = vld [vmem:[#allocation11 + $0x30] sm:$0xff]  ;;  %v355_v51 = vld [vmem:[#allocation11 + $0x38] sm:$0xff]  ;;  %vm1785_vm2 = vmpackc.low %vm489_vm1, %vm489_vm1  ;;  %vm482_vm3 = vcmp.lt.s32.totalorder %v1804_v5, 7 }
  0xad   :  { %1223 = vmatpush3.bf16.msra.mxu0 %v1220_v15  ;;  %v1260_v52 = vpack.c.bf16 %v355_v51, %v354_v50  ;;  %v347_v53 = vld [vmem:[#allocation7 + $0x8] sm:$0xff]  ;;  %v1076_v61 = vld [vmem:[#allocation16] ss:$0 sm:$0xff]  ;;  %p1533_p6 = pnand %p1532_p5, %p1526_p2 }
  0xae   :  { %1243 = vmatpush3.bf16.msra.mxu1 %v1240_v14  ;;  %1225 = vmatprep.subr.bf16.mxu0 %v1224_v21 }
  0xaf   :  { %1245 = vmatprep.subr.bf16.mxu1 %v1244_v22 }
  0xb1   :  { %1227 = vmatpush3.bf16.msra.mxu0 %v1224_v21 }
  0xb2   :  { %1247 = vmatpush3.bf16.msra.mxu1 %v1244_v22  ;;  %1229 = vmatprep.subr.bf16.mxu0 %v1228_v25 }
  0xb5   :  { %1171 = vmatmul.mubr.msk.f32.vlgmr.msra.gmra.mrb[0].mxu1 %vm166_vm0, %v249_v26  ;;  %1231 = vmatpush3.bf16.msra.mxu0 %v1228_v25 }
  0xb6   :  { %1249 = vmatprep.subr.bf16.mxu0 %v1248_v43 }
  0xb8   :  { %1152 = vmatmul.mubr.msk.f32.vlgmr.msra.gmra.mrb[0].mxu0 %vm166_vm0, %v150_v27 }
  0xb9   :  { %1251 = vmatpush3.bf16.msra.mxu0 %v1248_v43  ;;  %1189 = vmatprep.mubr.msk.f32.mxu0 %vm166_vm0, %v346_v48 }
  0xba   :  { %1253 = vmatprep.subr.bf16.mxu0 %v1252_v45 }
  0xbd   :  { %1255 = vmatpush3.bf16.msra.mxu0 %v1252_v45 }
  0xbe   :  { %1257 = vmatprep.subr.bf16.mxu0 %v1256_v49 }
  0xc1   :  { %1259 = vmatpush3.bf16.msra.mxu0 %v1256_v49 }
  0xc2   :  { %1261 = vmatprep.subr.bf16.mxu0 %v1260_v52 }
  0xc5   :  { %1263 = vmatpush3.bf16.msra.mxu0 %v1260_v52 }
  0xc8   :  { %1190 = vmatmul.mubr.msk.f32.vlgmr.msra.gmra.mrb[2].mxu0 %vm166_vm0, %v347_v53 }
 0x188   :  { %v1172_v29 = vpop.f32.mrb[0].mxu1 }
 0x189   :  { %v1772_v30 = vadd.f32 %v1172_v29, %v1073_v28  ;;  %v337_v31 = vpop.f32.mrb[1].mxu1 }
 0x18a   :  { %v338_v33 = vadd.f32 %v1073_v28, %v337_v31 }
 0x18b   :  { %v1153_v34 = vpop.f32.mrb[0].mxu0 }
 0x18c   :  { %454 = vrot.lane.b32.xlu0 %v338_v33, %s1570_s8  ;;  %v1775_v35 = vadd.f32 %v1153_v34, %v1070_v32  ;;  %v239_v36 = vpop.f32.mrb[1].mxu0 }
 0x18d   :  { %v240_v37 = vadd.f32 %v1070_v32, %v239_v36 }
 0x18f   :  { %1196 = vmatprep.mubr.msk.f32.mxu1 %vm489_vm1, %v240_v37 }
 0x190   :  { %446 = vrot.lane.b32.xlu0 %v338_v33, %s1571_s2 }
 0x19b   :  { %v1191_v60 = vpop.f32.mrb[2].mxu0 }
 0x19c   :  { %v1794_v62 = vadd.f32 %v1191_v60, %v1076_v61  ;;  %v435_v3 = vpop.f32.mrb[3].mxu0 }
 0x19d   :  { %v436_v16 = vadd.f32 %v1076_v61, %v435_v3 }
 0x1fe   :  { %v455_v38 = vpop.permute.xlu0 %454 }
 0x1ff   :  { %v460_v42 = vadd.f32 %v455_v38, %v338_v33 }
 0x201   :  { %487 = vrot.lane.b32.xlu1 %v460_v42, %s1571_s2 }
 0x202   :  { %v447_v54 = vpop.permute.xlu0 %446 }
 0x203   :  { %v452_v55 = vsub.f32 %v338_v33, %v447_v54 }
 0x205   :  { %484 = vrot.lane.b32.xlu1 %v240_v37, %s1571_s2 }
 0x273   :  { %v488_v56 = vpop.permute.xlu1 %487 }
 0x274   :  { %v1264_v58 = vpack.c.bf16 %v488_v56, %v452_v55 }
 0x276   :  { %1266 = vmatprep.subr.msk.bf16.mxu1 %vm1785_vm2, %v1264_v58 }
 0x277   :  { %1269 = vmatpush3.bf16.xpose.msk.msra.mxu1 %vm1785_vm2, %v1264_v58  ;;  %v485_v59 = vpop.permute.xlu1 %484 }
 0x27e   :  { %1197 = vmatmul.mubr.msk.f32.vlgmr.msra.gmra.mrb[2].mxu1 %vm489_vm1, %v485_v59 }
 0x351   :  { %v1198_v63 = vpop.f32.mrb[2].mxu1 }
 0x352   :  { %v1796_v0 = vmul.f32 0.17677669, %v1198_v63  ;;  %v565_v1 = vpop.f32.mrb[3].mxu1 }
 0x353   :  { %v1798_v2 = vmul.f32 0.17677669, %v565_v1 }
 0x354   :  { %607 = vrot.lane.b32.xlu0 %v1796_v0, %s1572_s23  ;;  %v577_v8 = vsel %vm482_vm3, %v1796_v0, -1e+30 }
 0x355   :  { %605 = vrot.lane.b32.xlu1 %v1798_v2, %s1572_s23  ;;  %v576_v6 = vsel %vm482_vm3, %v1798_v2, -1e+30  ;;  %v582_v9 = vsel %vm578_vm4, %v577_v8, -inf }
 0x356   :  { %v579_v7 = vsel %vm578_vm4, %v576_v6, -inf }
 0x373   :  { %580 = vmax.xlane.f32.xlu0 %v579_v7 }
 0x377   :  { %583 = vmax.xlane.f32.xlu0 %v582_v9 }
 0x3c6   :  { %v1815_v10 = vpop.permute.xlu0 %607 }
 0x3c7   :  { %v1817_v11 = vpop.permute.xlu1 %605  ;;  %v612_v12 = vsel %vm482_vm3, %v1815_v10, -1e+30 }
 0x3c8   :  { %v616_v13 = vsel %vm578_vm4, %v612_v12, -inf  ;;  %v611_v14 = vsel %vm482_vm3, %v1817_v11, -1e+30 }
 0x3c9   :  { %617 = vmax.xlane.f32.xlu1 %v616_v13  ;;  %v613_v15 = vsel %vm578_vm4, %v611_v14, -inf }
 0x3ca   :  { %614 = vmax.xlane.f32.xlu0 %v613_v15 }
 0x3da   :  { %456 = vrot.lane.b32.xlu1 %v1772_v30, %s1570_s8 }
 0x3de   :  { %464 = vrot.lane.b32.xlu1 %v436_v16, %s1571_s2 }
 0x3e2   :  { %448 = vrot.lane.b32.xlu1 %v1772_v30, %s1571_s2 }
 0x400   :  { %v581_v17 = vpop.xlane.xlu0 %580 }
 0x401   :  { %v585_v18 = vsub.f32 %v576_v6, %v581_v17 }
 0x403   :  { %v587_v19 = vmul.f32 1.442695, %v585_v18 }
 0x404   :  { %v584_v20 = vpop.xlane.xlu0 %583 }
 0x405   :  { %v586_v21 = vsub.f32 %v577_v8, %v584_v20  ;;  %1295 = vpow2.f32 %v587_v19 }
 0x407   :  { %v589_v22 = vmul.f32 1.442695, %v586_v21 }
 0x409   :  { %1297 = vpow2.f32 %v589_v22 }
 0x40f   :  { %v1296_v23 = vpop.eup %1295 }
 0x410   :  { %v591_v27 = vsel %vm482_vm3, %v1296_v23, 0.0 }
 0x411   :  { %v593_v28 = vsel %vm578_vm4, %v591_v27, 0.0 }
 0x413   :  { %v1298_v24 = vpop.eup %1297 }
 0x414   :  { %v592_v25 = vsel %vm482_vm3, %v1298_v24, 0.0 }
 0x415   :  { %v596_v26 = vsel %vm578_vm4, %v592_v25, 0.0 }
 0x416   :  { %597 = vadd.xlane.f32.xlu0 %v596_v26 }
 0x41a   :  { %594 = vadd.xlane.f32.xlu0 %v593_v28 }
 0x456   :  { %v618_v29 = vpop.xlane.xlu1 %617 }
 0x457   :  { %v620_v31 = vsub.f32 %v612_v12, %v618_v29  ;;  %v615_v32 = vpop.xlane.xlu0 %614 }
 0x458   :  { %v619_v33 = vsub.f32 %v611_v14, %v615_v32 }
 0x459   :  { %v623_v34 = vmul.f32 1.442695, %v620_v31 }
 0x45a   :  { %v621_v36 = vmul.f32 1.442695, %v619_v33  ;;  %v457_v37 = vpop.permute.xlu1 %456 }
 0x45b   :  { %1299 = vpow2.f32 %v623_v34  ;;  %v461_v38 = vadd.f32 %v457_v37, %v1772_v30 }
 0x45c   :  { %1301 = vpow2.f32 %v621_v36 }
 0x45d   :  { %773 = vrot.lane.b32.xlu1 %v461_v38, %s1571_s2 }
 0x45e   :  { %v465_v47 = vpop.permute.xlu1 %464 }
 0x45f   :  { %v470_v53 = vsub.f32 %v436_v16, %v465_v47 }
 0x461   :  { %770 = vrot.lane.b32.xlu1 %v1775_v35, %s1571_s2 }
 0x462   :  { %v449_v50 = vpop.permute.xlu1 %448 }
 0x463   :  { %v453_v56 = vsub.f32 %v1772_v30, %v449_v50 }
 0x465   :  { %v1300_v39 = vpop.eup %1299 }
 0x466   :  { %v1302_v40 = vpop.eup %1301  ;;  %v626_v41 = vsel %vm482_vm3, %v1300_v39, 0.0 }
 0x467   :  { %v630_v42 = vsel %vm578_vm4, %v626_v41, 0.0  ;;  %v625_v43 = vsel %vm482_vm3, %v1302_v40, 0.0 }
 0x468   :  { %631 = vadd.xlane.f32.xlu0 %v630_v42  ;;  %v627_v44 = vsel %vm578_vm4, %v625_v43, 0.0 }
 0x46c   :  { %628 = vadd.xlane.f32.xlu0 %v627_v44 }
 0x482   :  { %472 = vrot.lane.b32.xlu0 %v436_v16, %s1570_s8 }
 0x4a3   :  { %v598_v45 = vpop.xlane.xlu0 %597 }
 0x4a7   :  { %v595_v46 = vpop.xlane.xlu0 %594 }
 0x4a8   :  { %1303 = vrcp.f32 %v595_v46 }
 0x4b2   :  { %v1304_v52 = vpop.eup %1303 }
 0x4b3   :  { %v601_v60 = vmul.f32 %v1304_v52, %v591_v27 }
 0x4cf   :  { %v774_v54 = vpop.permute.xlu1 %773 }
 0x4d0   :  { %v1270_v61 = vpack.c.bf16 %v774_v54, %v453_v56 }
 0x4f5   :  { %v632_v48 = vpop.xlane.xlu0 %631 }
 0x4f6   :  { %1305 = vrcp.f32 %v632_v48 }
 0x4f7   :  { %1307 = vrcp.f32 %v598_v45 }
 0x4f9   :  { %v629_v49 = vpop.xlane.xlu0 %628 }
 0x4fa   :  { %1309 = vrcp.f32 %v629_v49 }
 0x4fd   :  { %v473_v51 = vpop.permute.xlu0 %472 }
 0x4fe   :  { %v478_v55 = vadd.f32 %v473_v51, %v436_v16  ;;  %v771_v16 = vpop.permute.xlu1 %770 }
 0x500   :  { %v1306_v58 = vpop.eup %1305  ;;  %v651_v59 = vsel %vm489_vm1, %v470_v53, %v478_v55 }
 0x501   :  { %v1851_v63 = vmul.f32 %v1306_v58, %v626_v41  ;;  %1199 = vmatprep.subr.mxu1 %v651_v59  ;;  %v1308_v1 = vpop.eup %1307 }
 0x502   :  { %1200 = vmatpush3.msra.mxu1 %v651_v59  ;;  %v602_v6 = vmul.f32 %v1308_v1, %v592_v25 }
 0x503   :  { %1272 = vmatprep.subr.msk.bf16.mxu1 %vm1785_vm2, %v1270_v61  ;;  %v649_v3 = vsub.f32 %v601_v60, %v1851_v63 }
 0x504   :  { %v1310_v4 = vpop.eup %1309 }
 0x505   :  { %v635_v7 = vmul.f32 %v1310_v4, %v625_v43  ;;  %1201 = vmatprep.mubr.msk.f32.mxu1 %vm578_vm4, %v649_v3 }
 0x507   :  { %v650_v30 = vadd.f32 %v635_v7, %v602_v6  ;;  %v643_v8 = vsub.f32 %v601_v60, %v635_v7  ;;  %v646_v9 = vadd.f32 %v635_v7, %v601_v60 }
 0x509   :  { %1202 = vmatmul.mubr.msk.f32.vlgmr.msra.gmra.mrb[4].mxu1 %vm578_vm4, %v650_v30  ;;  %v1858_v12 = vsub.f32 %v643_v8, %v602_v6  ;;  %v1860_v13 = vadd.f32 %v646_v9, %v602_v6 }
 0x50a   :  { %1275 = vmatpush3.bf16.xpose.msk.msra.mxu1 %vm1785_vm2, %v1270_v61  ;;  %1208 = vmatprep.mubr.msk.f32.mxu1 %vm489_vm1, %v1775_v35 }
 0x50b   :  { %v645_v14 = vsub.f32 %v1858_v12, %v1851_v63  ;;  %v648_v15 = vsub.f32 %v1860_v13, %v1851_v63 }
 0x511   :  { %1209 = vmatmul.mubr.msk.f32.vlgmr.msra.gmra.mrb[6].mxu1 %vm489_vm1, %v771_v16 }
 0x5dc   :  { %v1203_v17 = vpop.f32.mrb[4].mxu1 }
 0x5dd   :  { %v1871_v18 = vpop.f32.mrb[5].mxu1 }
 0x5e4   :  { %v1210_v19 = vpop.f32.mrb[6].mxu1 }
 0x5e5   :  { %v1873_v20 = vmul.f32 0.17677669, %v1210_v19  ;;  %v850_v57 = vpop.f32.mrb[7].mxu1 }
 0x5e6   :  { %v1875_v21 = vmul.f32 0.17677669, %v850_v57 }
 0x5e7   :  { %891 = vrot.lane.b32.xlu1 %v1873_v20, %s1572_s23  ;;  %v862_v23 = vsel %vm482_vm3, %v1873_v20, -1e+30 }
 0x5e8   :  { %v861_v35 = vsel %vm482_vm3, %v1875_v21, -1e+30  ;;  %v866_v24 = vsel %vm578_vm4, %v862_v23, -inf }
 0x5e9   :  { %v863_v22 = vsel %vm578_vm4, %v861_v35, -inf }
 0x5ea   :  { %864 = vmax.xlane.f32.xlu0 %v863_v22 }
 0x5eb   :  { %889 = vrot.lane.b32.xlu1 %v1875_v21, %s1572_s23 }
 0x5ee   :  { %867 = vmax.xlane.f32.xlu0 %v866_v24 }
 0x659   :  { %v1889_v25 = vpop.permute.xlu1 %891 }
 0x65a   :  { %v896_v26 = vsel %vm482_vm3, %v1889_v25, -1e+30 }
 0x65b   :  { %v900_v27 = vsel %vm578_vm4, %v896_v26, -inf }
 0x65c   :  { %901 = vmax.xlane.f32.xlu1 %v900_v27  ;;  %v640_v27 = vadd.f32 %v1817_v11, %v1798_v2 }
 0x65d   :  { %v1895_v28 = vpop.permute.xlu1 %889 }
 0x65e   :  { %v895_v29 = vsel %vm482_vm3, %v1895_v28, -1e+30  ;;  %v921_v24 = vsub.f32 %v1875_v21, %v1895_v28 }
 0x65f   :  { %v897_v31 = vsel %vm578_vm4, %v895_v29, -inf }
 0x660   :  { %898 = vmax.xlane.f32.xlu0 %v897_v31  ;;  %v924_v31 = vadd.f32 %v1895_v28, %v1875_v21 }
 0x677   :  { %v865_v32 = vpop.xlane.xlu0 %864 }
 0x678   :  { %v869_v33 = vsub.f32 %v861_v35, %v865_v32 }
 0x67a   :  { %v871_v34 = vmul.f32 1.442695, %v869_v33 }
 0x67b   :  { %v868_v36 = vpop.xlane.xlu0 %867 }
 0x67c   :  { %v870_v37 = vsub.f32 %v862_v23, %v868_v36  ;;  %1311 = vpow2.f32 %v871_v34  ;;  %v637_v23 = vsub.f32 %v1798_v2, %v1817_v11  ;;  %v641_v34 = vadd.f32 %v640_v27, %v1796_v0 }
 0x67d   :  { %v925_v36 = vadd.f32 %v924_v31, %v1873_v20 }
 0x67e   :  { %v873_v38 = vmul.f32 1.442695, %v870_v37  ;;  %v642_v11 = vsub.f32 %v641_v34, %v1815_v10 }
 0x67f   :  { %v926_v2 = vsub.f32 %v925_v36, %v1889_v25 }
 0x680   :  { %1313 = vpow2.f32 %v873_v38 }
 0x686   :  { %v1312_v39 = vpop.eup %1311 }
 0x687   :  { %v875_v43 = vsel %vm482_vm3, %v1312_v39, 0.0 }
 0x688   :  { %v877_v44 = vsel %vm578_vm4, %v875_v43, 0.0 }
 0x68a   :  { %v1314_v40 = vpop.eup %1313 }
 0x68b   :  { %v876_v41 = vsel %vm482_vm3, %v1314_v40, 0.0 }
 0x68c   :  { %v880_v42 = vsel %vm578_vm4, %v876_v41, 0.0 }
 0x68d   :  { %881 = vadd.xlane.f32.xlu1 %v880_v42 }
 0x691   :  { %878 = vadd.xlane.f32.xlu1 %v877_v44 }
 0x6a2   :  { %466 = vrot.lane.b32.xlu1 %v1794_v62, %s1571_s2 }
 0x6a6   :  { %734 = vrot.lane.b32.xlu1 %v1203_v17, %s1571_s2 }
 0x6aa   :  { %738 = vrot.lane.b32.xlu1 %v1203_v17, %s1570_s8 }
 0x6e9   :  { %v902_v45 = vpop.xlane.xlu1 %901 }
 0x6ea   :  { %v904_v46 = vsub.f32 %v896_v26, %v902_v45  ;;  %v638_v26 = vsub.f32 %v637_v23, %v1796_v0 }
 0x6ec   :  { %v907_v47 = vmul.f32 1.442695, %v904_v46  ;;  %v639_v38 = vsub.f32 %v638_v26, %v1815_v10 }
 0x6ed   :  { %v899_v48 = vpop.xlane.xlu0 %898 }
 0x6ee   :  { %1315 = vpow2.f32 %v907_v47  ;;  %v903_v49 = vsub.f32 %v895_v29, %v899_v48  ;;  %v922_v29 = vsub.f32 %v921_v24, %v1873_v20 }
 0x6f0   :  { %v905_v50 = vmul.f32 1.442695, %v903_v49  ;;  %v923_v37 = vsub.f32 %v922_v29, %v1889_v25 }
 0x6f2   :  { %1317 = vpow2.f32 %v905_v50 }
 0x6f8   :  { %v1316_v51 = vpop.eup %1315 }
 0x6f9   :  { %v910_v52 = vsel %vm482_vm3, %v1316_v51, 0.0 }
 0x6fa   :  { %v914_v53 = vsel %vm578_vm4, %v910_v52, 0.0 }
 0x6fb   :  { %915 = vadd.xlane.f32.xlu0 %v914_v53 }
 0x6fc   :  { %v1318_v54 = vpop.eup %1317 }
 0x6fd   :  { %v909_v55 = vsel %vm482_vm3, %v1318_v54, 0.0 }
 0x6fe   :  { %v911_v56 = vsel %vm578_vm4, %v909_v55, 0.0 }
 0x6ff   :  { %912 = vadd.xlane.f32.xlu0 %v911_v56 }
 0x715   :  { %474 = vrot.lane.b32.xlu0 %v1794_v62, %s1570_s8 }
 0x719   :  { %743 = vrot.lane.b32.xlu0 %v645_v14, %s1573_s17 }
 0x71a   :  { %v882_v58 = vpop.xlane.xlu1 %881 }
 0x71d   :  { %747 = vrot.lane.b32.xlu0 %v648_v15, %s1574_s29 }
 0x71e   :  { %v879_v59 = vpop.xlane.xlu1 %878 }
 0x71f   :  { %1319 = vrcp.f32 %v879_v59 }
 0x722   :  { %v467_v61 = vpop.permute.xlu1 %466 }
 0x723   :  { %v471_v4 = vsub.f32 %v1794_v62, %v467_v61 }
 0x726   :  { %v735_v21 = vpop.permute.xlu1 %734 }
 0x727   :  { %v737_v46 = vsub.f32 %v1871_v18, %v735_v21 }
 0x729   :  { %v1320_v3 = vpop.eup %1319 }
 0x72a   :  { %v885_v63 = vmul.f32 %v1320_v3, %v875_v43  ;;  %v739_v28 = vpop.permute.xlu1 %738 }
 0x72b   :  { %v741_v43 = vadd.f32 %v739_v28, %v1871_v18 }
 0x72d   :  { %v758_v49 = vsel %vm489_vm1, %v737_v46, %v741_v43 }
 0x788   :  { %v916_v5 = vpop.xlane.xlu0 %915 }
 0x789   :  { %1321 = vrcp.f32 %v916_v5 }
 0x78a   :  { %1323 = vrcp.f32 %v882_v58 }
 0x78c   :  { %v913_v60 = vpop.xlane.xlu0 %912 }
 0x78d   :  { %1325 = vrcp.f32 %v913_v60 }
 0x790   :  { %v475_v1 = vpop.permute.xlu0 %474 }
 0x791   :  { %v479_v6 = vadd.f32 %v475_v1, %v1794_v62 }
 0x793   :  { %v1322_v7 = vpop.eup %1321  ;;  %v935_v30 = vsel %vm489_vm1, %v471_v4, %v479_v6 }
 0x794   :  { %v920_v8 = vmul.f32 %v1322_v7, %v910_v52  ;;  %1211 = vmatprep.subr.mxu0 %v935_v30  ;;  %v1324_v9 = vpop.eup %1323  ;;  %v744_v39 = vpop.permute.xlu0 %743 }
 0x795   :  { %1212 = vmatpush3.msra.mxu0 %v935_v30  ;;  %v886_v14 = vmul.f32 %v1324_v9, %v876_v41  ;;  %v759_v51 = vsel %vm166_vm0, %v758_v49, %v744_v39 }
 0x796   :  { %v933_v12 = vsub.f32 %v885_v63, %v920_v8 }
 0x797   :  { %v1326_v13 = vpop.eup %1325 }
 0x798   :  { %v919_v15 = vmul.f32 %v1326_v13, %v909_v55  ;;  %1213 = vmatprep.mubr.msk.f32.mxu0 %vm578_vm4, %v933_v12  ;;  %v748_v40 = vpop.permute.xlu0 %747 }
 0x799   :  { %v761_v52 = vsel %vm760_vm5, %v759_v51, %v748_v40 }
 0x79a   :  { %v934_v16 = vadd.f32 %v919_v15, %v886_v14  ;;  %v927_v17 = vsub.f32 %v885_v63, %v919_v15  ;;  %v930_v19 = vadd.f32 %v919_v15, %v885_v63 }
 0x79c   :  { %1214 = vmatmul.mubr.msk.f32.vlgmr.msra.gmra.mrb[4].mxu0 %vm578_vm4, %v934_v16  ;;  %v928_v62 = vsub.f32 %v927_v17, %v886_v14  ;;  %v931_v35 = vadd.f32 %v930_v19, %v886_v14 }
 0x79e   :  { %v929_v57 = vsub.f32 %v928_v62, %v920_v8  ;;  %v932_v22 = vsub.f32 %v931_v35, %v920_v8 }
 0x7a0   :  { %1027 = vrot.lane.b32.xlu1 %v929_v57, %s1573_s17 }
 0x7a4   :  { %1031 = vrot.lane.b32.xlu1 %v932_v22, %s1574_s29 }
 0x812   :  { %v1028_v0 = vpop.permute.xlu1 %1027 }
 0x816   :  { %v1032_v20 = vpop.permute.xlu1 %1031 }
 0x86f   :  { %v1215_v32 = vpop.f32.mrb[4].mxu0 }
 0x870   :  { %1022 = vrot.lane.b32.xlu1 %v1215_v32, %s1570_s8  ;;  %1018 = vrot.lane.b32.xlu0 %v1215_v32, %s1571_s2  ;;  %v1008_v33 = vpop.f32.mrb[5].mxu0 }
 0x874   :  { %1035 = vrot.lane.b32.xlu1 %v923_v37, %s1575_s30  ;;  %751 = vrot.lane.b32.xlu0 %v639_v38, %s1575_s30 }
 0x878   :  { %1039 = vrot.lane.b32.xlu1 %v926_v2, %s1576_s11  ;;  %755 = vrot.lane.b32.xlu0 %v642_v11, %s1576_s11 }
 0x8e2   :  { %v1023_v41 = vpop.permute.xlu1 %1022  ;;  %v1019_v42 = vpop.permute.xlu0 %1018 }
 0x8e3   :  { %v1025_v44 = vadd.f32 %v1023_v41, %v1008_v33  ;;  %v1021_v45 = vsub.f32 %v1008_v33, %v1019_v42 }
 0x8e5   :  { %v1042_v25 = vsel %vm489_vm1, %v1021_v45, %v1025_v44 }
 0x8e6   :  { %v1036_v10 = vpop.permute.xlu1 %1035  ;;  %v1043_v47 = vsel %vm166_vm0, %v1042_v25, %v1028_v0  ;;  %v752_v48 = vpop.permute.xlu0 %751 }
 0x8e7   :  { %v1044_v50 = vsel %vm760_vm5, %v1043_v47, %v1032_v20  ;;  %v763_v18 = vsel %vm762_vm6, %v761_v52, %v752_v48 }
 0x8e8   :  { %v1045_v53 = vsel %vm762_vm6, %v1044_v50, %v1036_v10 }
 0x8ea   :  { %v1040_v54 = vpop.permute.xlu1 %1039  ;;  %v756_v55 = vpop.permute.xlu0 %755 }
 0x8eb   :  { %v1046_v56 = vsel %vm764_vm7, %v1045_v53, %v1040_v54  ;;  %v765_v58 = vsel %vm764_vm7, %v763_v18, %v756_v55 }
 0x8ec   :  { %v1047_v59 = vsel %vm766_vm8, %v1046_v56, 0.0  ;;  %v767_v5 = vsel %vm766_vm8, %v765_v58, 0.0 }
 0x8ed   :  { %1048 = vst [vmem:[#allocation17 + $0x8] sm:$0xff] %v1047_v59  ;;  %768 = vst [vmem:[#allocation17] sm:$0xff] %v767_v5 }
 0x8ee   :  { %1536 = shalt.err (!%p1533_p6)
}
 0x8ef   :  { %s1537_s5 = scalar_lea.hbm %s1979_s9, 256 }
 0x8f0   :  { %p1538_p7 = scmp.ne.s32.totalorder %s1979_s9, %s1537_s5  ;;  %p1541_p8 = scmp.lt.u32.totalorder %s1537_s5, %s1979_s9 }
 0x8f2   :  { %p1543_p9 = pnand %p1541_p8, %p1538_p7 }
 0x8f4   :  { %1546 = shalt.err (!%p1543_p9)
}
 0x8f5   :  { %1060 = dma.vmem_to_hbm [thread:$0]  %s1055_s1, 256, %s1979_s9, [#allocation4], %s1561_s21, %s1561_s21, %s1562_s22  }
 0x8f6   :  { %1557 = dma.done.wait [#allocation4], 256  }
 0x8f7   :  { %1558 = vsyncadd [#allocation4], 4294967040 }
 0x8f8   :  { %1064 = vsyncpa [#allocation3], 1 }
 0x8f9   :  { %1065 = vsyncpa [#allocation6], 1 }
 0x8fa   :  { %1066 = vsyncpa [#allocation9], 1 }
 0x8fb   :  { %1067 = vsyncpa [#allocation12], 1 }
 0x8fc   :  { %1068 = vsyncpa [#allocation15], 1 }
 0x8fd   :  { %1069 = vsyncpa [#allocation4], 1 }

</bundles_post_ra>
